<compile_context>
chip_gen: v5e
topology: v5e:2x2
jax: 0.10.0
libtpu: 0.0.40
codegen_flags: <defaults>
</compile_context>

<pallas_src>
import jax
import jax.numpy as jnp
from jax import lax
from jax.experimental import pallas as pl
from jax.experimental.pallas import tpu as pltpu


def _round_up(x, m):
    return ((x + m - 1) // m) * m


_COMPILER_PARAMS = pltpu.CompilerParams(dimension_semantics=("parallel",))

# FC lane-padded dims (review: lane-dense FC — pad 400/120/84/10 up to 128s).
_FC_IN, _FC_H1, _FC_H2, _FC_OUT = 512, 128, 128, 128


# ----------------------------------------------------------------------------
# Pallas kernels.
# ----------------------------------------------------------------------------
def _conv_pool_kernel(w_ref, b_ref, x_ref, o_ref):
    # w: (4, cout, Kp) bf16 (one zero-embedded 5x5 weight per pool quadrant)
    # b: (cout, 1) f32,  x: (Kp, TM) bf16 patches (one column per pooled pixel)
    # o: (cout, TM) bf16  — Conv2d + Sigmoid + AvgPool2d(2,2), fused.
    x = x_ref[...]
    b = b_ref[...]
    acc = jax.nn.sigmoid(
        jnp.dot(w_ref[0], x, preferred_element_type=jnp.float32) + b)
    for q in range(1, 4):  # static unroll over the 4 pool quadrants
        acc = acc + jax.nn.sigmoid(
            jnp.dot(w_ref[q], x, preferred_element_type=jnp.float32) + b)
    o_ref[...] = (acc * 0.25).astype(o_ref.dtype)


def _fc_kernel(x_ref, w1_ref, b1_ref, w2_ref, b2_ref, w3_ref, b3_ref, o_ref):
    # Fused Linear(512,128)+Sigmoid -> Linear(128,128)+Sigmoid -> Linear(128,128).
    # All lane dims are 128-padded; pad rows of the following weight are zero,
    # so the sigmoid(0)=0.5 values in padded lanes never reach the result.
    h = jnp.dot(x_ref[...], w1_ref[...], preferred_element_type=jnp.float32)
    h = jax.nn.sigmoid(h + b1_ref[...])
    h = jnp.dot(h.astype(jnp.bfloat16), w2_ref[...],
                preferred_element_type=jnp.float32)
    h = jax.nn.sigmoid(h + b2_ref[...])
    y = jnp.dot(h.astype(jnp.bfloat16), w3_ref[...],
                preferred_element_type=jnp.float32)
    o_ref[...] = (y + b3_ref[...]).astype(o_ref.dtype)


# ----------------------------------------------------------------------------
# Conv block wrapper:  Conv2d(k=5) + Sigmoid + AvgPool2d(2,2) in one kernel.
# ----------------------------------------------------------------------------
def _conv_tiles(m, max_tm=2048):
    """Pad M to a lane-dense size; pick a tile giving >=2 full-width grid steps
    (v7x megacore) when M allows it."""
    mp = _round_up(m, 128)
    if mp <= 128:
        return mp, mp                       # degenerate: single full-extent step
    steps = max(2, pl.cdiv(mp, max_tm))
    tm = _round_up(pl.cdiv(mp, steps), 128)
    return tm, tm * steps


def conv_sigmoid_pool(x, w4, b_col, *, pad, lhs_layout):
    """x in `lhs_layout` ("NCHW" or "CNHW") -> pooled activation (cout, n, oh/2, ow/2) bf16.

    The 6x6 / stride-2 patch of the (pad-padded) input at pooled position (po, qo)
    is the union of the four 5x5 conv windows pooled into that pixel; matching it
    against the 4 quadrant-embedded weights reproduces Conv2d -> Sigmoid -> AvgPool.
    """
    _, cout, kp = w4.shape
    n = x.shape[lhs_layout.index("N")]

    # im2col (stride 2): feature axis comes out leading ("CNHW"), channel-major
    # (cin, kh, kw) order — matches torch's Conv2d weight flattening.  No transposes.
    patches = lax.conv_general_dilated_patches(
        x.astype(jnp.bfloat16), filter_shape=(6, 6), window_strides=(2, 2),
        padding=[(pad, pad), (pad, pad)],
        dimension_numbers=(lhs_layout, "OIHW", "CNHW"))      # (K6, n, ohp, owp)
    k6, _, ohp, owp = patches.shape
    m = n * ohp * owp
    tm, mp = _conv_tiles(m)
    patches = jnp.pad(patches.reshape(k6, m), ((0, kp - k6), (0, mp - m)))

    y = pl.pallas_call(
        _conv_pool_kernel,
        out_shape=jax.ShapeDtypeStruct((cout, mp), jnp.bfloat16),
        grid=(mp // tm,),
        in_specs=[
            pl.BlockSpec((4, cout, kp), lambda i: (0, 0, 0)),  # weights, VMEM-resident
            pl.BlockSpec((cout, 1), lambda i: (0, 0)),         # bias, resident
            pl.BlockSpec((kp, tm), lambda i: (0, i)),          # patch tile (lane axis = M)
        ],
        out_specs=pl.BlockSpec((cout, tm), lambda i: (0, i)),
        compiler_params=_COMPILER_PARAMS,
    )(w4, b_col, patches)                                      # (cout, Mp) bf16

    # Channel-major output feeds the next block directly (no transpose back).
    return y[:, :m].reshape(cout, n, ohp, owp)


# ----------------------------------------------------------------------------
# Fused FC stack.
# ----------------------------------------------------------------------------
def fc_stack(feats, p):
    n, kin = feats.shape
    x = jnp.pad(feats.astype(jnp.bfloat16), ((0, 0), (0, _FC_IN - kin)))
    # TODO(synk): with batch=2 this call has a single grid step, so only one v7x
    # TensorCore is used; sub-8-row batch tiles are not worth splitting.
    tb = n if n <= 256 else 256
    nb = _round_up(n, tb)
    if nb != n:
        x = jnp.pad(x, ((0, nb - n), (0, 0)))

    out = pl.pallas_call(
        _fc_kernel,
        out_shape=jax.ShapeDtypeStruct((nb, _FC_OUT), jnp.float32),
        grid=(nb // tb,),
        in_specs=[
            pl.BlockSpec((tb, _FC_IN), lambda i: (i, 0)),
            pl.BlockSpec((_FC_IN, _FC_H1), lambda i: (0, 0)),
            pl.BlockSpec((1, _FC_H1), lambda i: (0, 0)),
            pl.BlockSpec((_FC_H1, _FC_H2), lambda i: (0, 0)),
            pl.BlockSpec((1, _FC_H2), lambda i: (0, 0)),
            pl.BlockSpec((_FC_H2, _FC_OUT), lambda i: (0, 0)),
            pl.BlockSpec((1, _FC_OUT), lambda i: (0, 0)),
        ],
        out_specs=pl.BlockSpec((tb, _FC_OUT), lambda i: (i, 0)),
        compiler_params=_COMPILER_PARAMS,
    )(x, p["fc1_w"], p["fc1_b"], p["fc2_w"], p["fc2_b"], p["fc3_w"], p["fc3_b"])
    return out[:n, :10]


# ----------------------------------------------------------------------------
# Forward pass.
# ----------------------------------------------------------------------------
def lenet_forward(x, p):
    n = x.shape[0]
    # conv_block1: Conv2d(1, 6, k=5, pad=2) + Sigmoid + AvgPool2d(2, 2)
    a1 = conv_sigmoid_pool(x, p["c1w"], p["c1b"], pad=2, lhs_layout="NCHW")   # (6, n, 14, 14)
    # conv_block2 (corrected shapes, see TODO): Conv2d(6,16,k=5,pad=0)+Sigmoid+AvgPool2d(2,2)
    a2 = conv_sigmoid_pool(a1, p["c2w"], p["c2b"], pad=0, lhs_layout="CNHW")  # (16, n, 5, 5)
    # fc: Flatten (torch order C,H,W) -> fused Linear/Sigmoid stack.
    feats = a2.transpose(1, 0, 2, 3).reshape(n, 16 * 5 * 5)   # tiny (n*400) relayout
    return fc_stack(feats, p)                                 # (n, 10) f32


# ----------------------------------------------------------------------------
# Parameters (torch conventions) and one-time packing for the kernels.
# ----------------------------------------------------------------------------
def init_params(key):
    ks = jax.random.split(key, 10)
    s = 0.1
    return {
        "conv1_w": jax.random.normal(ks[0], (6, 1, 5, 5), jnp.float32) * s,
        "conv1_b": jax.random.normal(ks[1], (6,), jnp.float32) * s,
        "conv2_w": jax.random.normal(ks[2], (16, 6, 5, 5), jnp.float32) * s,
        "conv2_b": jax.random.normal(ks[3], (16,), jnp.float32) * s,
        "fc1_w": jax.random.normal(ks[4], (120, 400), jnp.float32) * s,
        "fc1_b": jax.random.normal(ks[5], (120,), jnp.float32) * s,
        "fc2_w": jax.random.normal(ks[6], (84, 120), jnp.float32) * s,
        "fc2_b": jax.random.normal(ks[7], (84,), jnp.float32) * s,
        "fc3_w": jax.random.normal(ks[8], (10, 84), jnp.float32) * s,
        "fc3_b": jax.random.normal(ks[9], (10,), jnp.float32) * s,
    }


def prepare_params(params):
    """One-time repack: quadrant-embedded bf16 conv weights, 128-lane-padded FC mats."""
    def conv_prep(w, b):
        cout, cin, kh, kw = w.shape
        k6 = cin * (kh + 1) * (kw + 1)
        kp = _round_up(k6, 32)
        slabs = []
        for dy in (0, 1):           # pool quadrant row offset
            for dx in (0, 1):       # pool quadrant col offset
                wq = jnp.zeros((cout, cin, kh + 1, kw + 1), jnp.float32)
                wq = wq.at[:, :, dy:dy + kh, dx:dx + kw].set(w)
                slabs.append(wq.reshape(cout, k6))
        w4 = jnp.stack(slabs, axis=0).astype(jnp.bfloat16)      # (4, cout, K6)
        w4 = jnp.pad(w4, ((0, 0), (0, 0), (0, kp - k6)))
        return w4, b.reshape(cout, 1).astype(jnp.float32)

    def fc_prep(w, b, kin_p, kout_p):
        kout, kin = w.shape
        wt = jnp.pad(w.T.astype(jnp.bfloat16),
                     ((0, kin_p - kin), (0, kout_p - kout)))    # zero pad rows/cols
        bp = jnp.pad(b.reshape(1, -1).astype(jnp.float32),
                     ((0, 0), (0, kout_p - kout)))
        return wt, bp

    c1w, c1b = conv_prep(params["conv1_w"], params["conv1_b"])
    c2w, c2b = conv_prep(params["conv2_w"], params["conv2_b"])
    fc1_w, fc1_b = fc_prep(params["fc1_w"], params["fc1_b"], _FC_IN, _FC_H1)
    fc2_w, fc2_b = fc_prep(params["fc2_w"], params["fc2_b"], _FC_H1, _FC_H2)
    fc3_w, fc3_b = fc_prep(params["fc3_w"], params["fc3_b"], _FC_H2, _FC_OUT)
    return {
        "c1w": c1w, "c1b": c1b, "c2w": c2w, "c2b": c2b,
        "fc1_w": fc1_w, "fc1_b": fc1_b,
        "fc2_w": fc2_w, "fc2_b": fc2_b,
        "fc3_w": fc3_w, "fc3_b": fc3_b,
    }


if __name__ == "__main__":
    key = jax.random.PRNGKey(0)
    k_params, k_x = jax.random.split(key)
    params = init_params(k_params)
    prepped = prepare_params(params)
    x = jax.random.normal(k_x, (2, 1, 28, 28), jnp.float32)   # NCHW, LeNet-sized input

    out = jax.jit(lenet_forward)(x, prepped)
    out = jax.block_until_ready(out)
    assert out.shape == (2, 10) and out.dtype == jnp.float32
    print("KERNEL_OK")
</pallas_src>

<mosaic_0001>
module attributes {stable_mosaic.version = 11 : i64} {
  func.func @_conv_pool_kernel(%arg0: i32, %arg1: memref<4x6x64xbf16, #tpu.memory_space<vmem>>, %arg2: memref<6x1xf32, #tpu.memory_space<vmem>>, %arg3: memref<64x256xbf16, #tpu.memory_space<vmem>>, %arg4: memref<6x256xbf16, #tpu.memory_space<vmem>>) attributes {dimension_semantics = [#tpu.dimension_semantics<parallel>], iteration_bounds = array<i64: 2>, scalar_prefetch = 0 : i64, scratch_operands = 0 : i64, tpu.core_type = #tpu.core_type<tc>, window_params = [{pipeline_mode = #tpu.pipeline_mode<synchronous>, transform_indices = @transform_0, window_bounds = array<i64: 4, 6, 64>}, {pipeline_mode = #tpu.pipeline_mode<synchronous>, transform_indices = @transform_1, window_bounds = array<i64: 6, 1>}, {transform_indices = @transform_2, window_bounds = array<i64: 64, 256>}, {transform_indices = @transform_3, window_bounds = array<i64: 6, 256>}]} {
    %c0 = arith.constant 0 : index
    %c0_0 = arith.constant 0 : index
    %0 = vector.load %arg3[%c0, %c0_0] : memref<64x256xbf16, #tpu.memory_space<vmem>>, vector<64x256xbf16>
    %c0_1 = arith.constant 0 : index
    %c0_2 = arith.constant 0 : index
    %1 = vector.load %arg2[%c0_1, %c0_2] : memref<6x1xf32, #tpu.memory_space<vmem>>, vector<6x1xf32>
    %c0_3 = arith.constant 0 : index
    %c0_4 = arith.constant 0 : index
    %c0_5 = arith.constant 0 : index
    %2 = vector.load %arg1[%c0_3, %c0_4, %c0_5] : memref<4x6x64xbf16, #tpu.memory_space<vmem>>, vector<1x6x64xbf16>
    %3 = vector.shape_cast %2 : vector<1x6x64xbf16> to vector<6x64xbf16>
    %cst = arith.constant dense<0.000000e+00> : vector<6x256xf32>
    %4 = tpu.matmul %3, %0, %cst {dimension_numbers = #tpu.dot_dimension_numbers<[1], [0], [0], [1], [0, 0, 1, 1], [], []>} : vector<6x64xbf16>, vector<64x256xbf16>, vector<6x256xf32> -> vector<6x256xf32>
    %5 = vector.broadcast %1 : vector<6x1xf32> to vector<6x256xf32>
    %6 = arith.addf %4, %5 : vector<6x256xf32>
    %7 = arith.negf %6 : vector<6x256xf32>
    %8 = math.exp %7 : vector<6x256xf32>
    %cst_6 = arith.constant 1.000000e+00 : f32
    %9 = vector.broadcast %cst_6 : f32 to vector<6x256xf32>
    %10 = arith.addf %9, %8 : vector<6x256xf32>
    %11 = arith.divf %9, %10 : vector<6x256xf32>
    %c1 = arith.constant 1 : index
    %c0_7 = arith.constant 0 : index
    %c0_8 = arith.constant 0 : index
    %12 = vector.load %arg1[%c1, %c0_7, %c0_8] : memref<4x6x64xbf16, #tpu.memory_space<vmem>>, vector<1x6x64xbf16>
    %13 = vector.shape_cast %12 : vector<1x6x64xbf16> to vector<6x64xbf16>
    %cst_9 = arith.constant dense<0.000000e+00> : vector<6x256xf32>
    %14 = tpu.matmul %13, %0, %cst_9 {dimension_numbers = #tpu.dot_dimension_numbers<[1], [0], [0], [1], [0, 0, 1, 1], [], []>} : vector<6x64xbf16>, vector<64x256xbf16>, vector<6x256xf32> -> vector<6x256xf32>
    %15 = vector.broadcast %1 : vector<6x1xf32> to vector<6x256xf32>
    %16 = arith.addf %14, %15 : vector<6x256xf32>
    %17 = arith.negf %16 : vector<6x256xf32>
    %18 = math.exp %17 : vector<6x256xf32>
    %cst_10 = arith.constant 1.000000e+00 : f32
    %19 = vector.broadcast %cst_10 : f32 to vector<6x256xf32>
    %20 = arith.addf %19, %18 : vector<6x256xf32>
    %21 = arith.divf %19, %20 : vector<6x256xf32>
    %22 = arith.addf %11, %21 : vector<6x256xf32>
    %c2 = arith.constant 2 : index
    %c0_11 = arith.constant 0 : index
    %c0_12 = arith.constant 0 : index
    %23 = vector.load %arg1[%c2, %c0_11, %c0_12] : memref<4x6x64xbf16, #tpu.memory_space<vmem>>, vector<1x6x64xbf16>
    %24 = vector.shape_cast %23 : vector<1x6x64xbf16> to vector<6x64xbf16>
    %cst_13 = arith.constant dense<0.000000e+00> : vector<6x256xf32>
    %25 = tpu.matmul %24, %0, %cst_13 {dimension_numbers = #tpu.dot_dimension_numbers<[1], [0], [0], [1], [0, 0, 1, 1], [], []>} : vector<6x64xbf16>, vector<64x256xbf16>, vector<6x256xf32> -> vector<6x256xf32>
    %26 = vector.broadcast %1 : vector<6x1xf32> to vector<6x256xf32>
    %27 = arith.addf %25, %26 : vector<6x256xf32>
    %28 = arith.negf %27 : vector<6x256xf32>
    %29 = math.exp %28 : vector<6x256xf32>
    %cst_14 = arith.constant 1.000000e+00 : f32
    %30 = vector.broadcast %cst_14 : f32 to vector<6x256xf32>
    %31 = arith.addf %30, %29 : vector<6x256xf32>
    %32 = arith.divf %30, %31 : vector<6x256xf32>
    %33 = arith.addf %22, %32 : vector<6x256xf32>
    %c3 = arith.constant 3 : index
    %c0_15 = arith.constant 0 : index
    %c0_16 = arith.constant 0 : index
    %34 = vector.load %arg1[%c3, %c0_15, %c0_16] : memref<4x6x64xbf16, #tpu.memory_space<vmem>>, vector<1x6x64xbf16>
    %35 = vector.shape_cast %34 : vector<1x6x64xbf16> to vector<6x64xbf16>
    %cst_17 = arith.constant dense<0.000000e+00> : vector<6x256xf32>
    %36 = tpu.matmul %35, %0, %cst_17 {dimension_numbers = #tpu.dot_dimension_numbers<[1], [0], [0], [1], [0, 0, 1, 1], [], []>} : vector<6x64xbf16>, vector<64x256xbf16>, vector<6x256xf32> -> vector<6x256xf32>
    %37 = vector.broadcast %1 : vector<6x1xf32> to vector<6x256xf32>
    %38 = arith.addf %36, %37 : vector<6x256xf32>
    %39 = arith.negf %38 : vector<6x256xf32>
    %40 = math.exp %39 : vector<6x256xf32>
    %cst_18 = arith.constant 1.000000e+00 : f32
    %41 = vector.broadcast %cst_18 : f32 to vector<6x256xf32>
    %42 = arith.addf %41, %40 : vector<6x256xf32>
    %43 = arith.divf %41, %42 : vector<6x256xf32>
    %44 = arith.addf %33, %43 : vector<6x256xf32>
    %cst_19 = arith.constant 2.500000e-01 : f32
    %45 = vector.broadcast %cst_19 : f32 to vector<6x256xf32>
    %46 = arith.mulf %44, %45 : vector<6x256xf32>
    %47 = arith.truncf %46 : vector<6x256xf32> to vector<6x256xbf16>
    %c0_20 = arith.constant 0 : index
    %c0_21 = arith.constant 0 : index
    %48 = vector.load %arg4[%c0_20, %c0_21] : memref<6x256xbf16, #tpu.memory_space<vmem>>, vector<6x256xbf16>
    tpu.vector_store %arg4[%c0_20, %c0_21], %47 {strides = array<i32>} : memref<6x256xbf16, #tpu.memory_space<vmem>>, vector<6x256xbf16>,
    return
  }
  func.func @transform_0(%arg0: i32) -> (i32, i32, i32) {
    %c0_i32 = arith.constant 0 : i32
    %c0_i32_0 = arith.constant 0 : i32
    %c0_i32_1 = arith.constant 0 : i32
    %c0_i32_2 = arith.constant 0 : i32
    return %c0_i32, %c0_i32_0, %c0_i32_1 : i32, i32, i32
  }
  func.func @transform_1(%arg0: i32) -> (i32, i32) {
    %c0_i32 = arith.constant 0 : i32
    %c0_i32_0 = arith.constant 0 : i32
    %c0_i32_1 = arith.constant 0 : i32
    return %c0_i32, %c0_i32_0 : i32, i32
  }
  func.func @transform_2(%arg0: i32) -> (i32, i32) {
    %c0_i32 = arith.constant 0 : i32
    %c0_i32_0 = arith.constant 0 : i32
    return %c0_i32, %arg0 : i32, i32
  }
  func.func @transform_3(%arg0: i32) -> (i32, i32) {
    %c0_i32 = arith.constant 0 : i32
    %c0_i32_0 = arith.constant 0 : i32
    return %c0_i32, %arg0 : i32, i32
  }
}

module attributes {stable_mosaic.version = 11 : i64} {
  func.func @_conv_pool_kernel(%arg0: i32, %arg1: memref<4x16x224xbf16, #tpu.memory_space<vmem>>, %arg2: memref<16x1xf32, #tpu.memory_space<vmem>>, %arg3: memref<224x128xbf16, #tpu.memory_space<vmem>>, %arg4: memref<16x128xbf16, #tpu.memory_space<vmem>>) attributes {dimension_semantics = [#tpu.dimension_semantics<parallel>], iteration_bounds = array<i64: 1>, scalar_prefetch = 0 : i64, scratch_operands = 0 : i64, tpu.core_type = #tpu.core_type<tc>, window_params = [{pipeline_mode = #tpu.pipeline_mode<synchronous>, transform_indices = @transform_0, window_bounds = array<i64: 4, 16, 224>}, {pipeline_mode = #tpu.pipeline_mode<synchronous>, transform_indices = @transform_1, window_bounds = array<i64: 16, 1>}, {transform_indices = @transform_2, window_bounds = array<i64: 224, 128>}, {transform_indices = @transform_3, window_bounds = array<i64: 16, 128>}]} {
    %c0 = arith.constant 0 : index
    %c0_0 = arith.constant 0 : index
    %0 = vector.load %arg3[%c0, %c0_0] : memref<224x128xbf16, #tpu.memory_space<vmem>>, vector<224x128xbf16>
    %c0_1 = arith.constant 0 : index
    %c0_2 = arith.constant 0 : index
    %1 = vector.load %arg2[%c0_1, %c0_2] : memref<16x1xf32, #tpu.memory_space<vmem>>, vector<16x1xf32>
    %c0_3 = arith.constant 0 : index
    %c0_4 = arith.constant 0 : index
    %c0_5 = arith.constant 0 : index
    %2 = vector.load %arg1[%c0_3, %c0_4, %c0_5] : memref<4x16x224xbf16, #tpu.memory_space<vmem>>, vector<1x16x224xbf16>
    %3 = vector.shape_cast %2 : vector<1x16x224xbf16> to vector<16x224xbf16>
    %cst = arith.constant dense<0.000000e+00> : vector<16x128xf32>
    %4 = tpu.matmul %3, %0, %cst {dimension_numbers = #tpu.dot_dimension_numbers<[1], [0], [0], [1], [0, 0, 1, 1], [], []>} : vector<16x224xbf16>, vector<224x128xbf16>, vector<16x128xf32> -> vector<16x128xf32>
    %5 = vector.broadcast %1 : vector<16x1xf32> to vector<16x128xf32>
    %6 = arith.addf %4, %5 : vector<16x128xf32>
    %7 = arith.negf %6 : vector<16x128xf32>
    %8 = math.exp %7 : vector<16x128xf32>
    %cst_6 = arith.constant 1.000000e+00 : f32
    %9 = vector.broadcast %cst_6 : f32 to vector<16x128xf32>
    %10 = arith.addf %9, %8 : vector<16x128xf32>
    %11 = arith.divf %9, %10 : vector<16x128xf32>
    %c1 = arith.constant 1 : index
    %c0_7 = arith.constant 0 : index
    %c0_8 = arith.constant 0 : index
    %12 = vector.load %arg1[%c1, %c0_7, %c0_8] : memref<4x16x224xbf16, #tpu.memory_space<vmem>>, vector<1x16x224xbf16>
    %13 = vector.shape_cast %12 : vector<1x16x224xbf16> to vector<16x224xbf16>
    %cst_9 = arith.constant dense<0.000000e+00> : vector<16x128xf32>
    %14 = tpu.matmul %13, %0, %cst_9 {dimension_numbers = #tpu.dot_dimension_numbers<[1], [0], [0], [1], [0, 0, 1, 1], [], []>} : vector<16x224xbf16>, vector<224x128xbf16>, vector<16x128xf32> -> vector<16x128xf32>
    %15 = vector.broadcast %1 : vector<16x1xf32> to vector<16x128xf32>
    %16 = arith.addf %14, %15 : vector<16x128xf32>
    %17 = arith.negf %16 : vector<16x128xf32>
    %18 = math.exp %17 : vector<16x128xf32>
    %cst_10 = arith.constant 1.000000e+00 : f32
    %19 = vector.broadcast %cst_10 : f32 to vector<16x128xf32>
    %20 = arith.addf %19, %18 : vector<16x128xf32>
    %21 = arith.divf %19, %20 : vector<16x128xf32>
    %22 = arith.addf %11, %21 : vector<16x128xf32>
    %c2 = arith.constant 2 : index
    %c0_11 = arith.constant 0 : index
    %c0_12 = arith.constant 0 : index
    %23 = vector.load %arg1[%c2, %c0_11, %c0_12] : memref<4x16x224xbf16, #tpu.memory_space<vmem>>, vector<1x16x224xbf16>
    %24 = vector.shape_cast %23 : vector<1x16x224xbf16> to vector<16x224xbf16>
    %cst_13 = arith.constant dense<0.000000e+00> : vector<16x128xf32>
    %25 = tpu.matmul %24, %0, %cst_13 {dimension_numbers = #tpu.dot_dimension_numbers<[1], [0], [0], [1], [0, 0, 1, 1], [], []>} : vector<16x224xbf16>, vector<224x128xbf16>, vector<16x128xf32> -> vector<16x128xf32>
    %26 = vector.broadcast %1 : vector<16x1xf32> to vector<16x128xf32>
    %27 = arith.addf %25, %26 : vector<16x128xf32>
    %28 = arith.negf %27 : vector<16x128xf32>
    %29 = math.exp %28 : vector<16x128xf32>
    %cst_14 = arith.constant 1.000000e+00 : f32
    %30 = vector.broadcast %cst_14 : f32 to vector<16x128xf32>
    %31 = arith.addf %30, %29 : vector<16x128xf32>
    %32 = arith.divf %30, %31 : vector<16x128xf32>
    %33 = arith.addf %22, %32 : vector<16x128xf32>
    %c3 = arith.constant 3 : index
    %c0_15 = arith.constant 0 : index
    %c0_16 = arith.constant 0 : index
    %34 = vector.load %arg1[%c3, %c0_15, %c0_16] : memref<4x16x224xbf16, #tpu.memory_space<vmem>>, vector<1x16x224xbf16>
    %35 = vector.shape_cast %34 : vector<1x16x224xbf16> to vector<16x224xbf16>
    %cst_17 = arith.constant dense<0.000000e+00> : vector<16x128xf32>
    %36 = tpu.matmul %35, %0, %cst_17 {dimension_numbers = #tpu.dot_dimension_numbers<[1], [0], [0], [1], [0, 0, 1, 1], [], []>} : vector<16x224xbf16>, vector<224x128xbf16>, vector<16x128xf32> -> vector<16x128xf32>
    %37 = vector.broadcast %1 : vector<16x1xf32> to vector<16x128xf32>
    %38 = arith.addf %36, %37 : vector<16x128xf32>
    %39 = arith.negf %38 : vector<16x128xf32>
    %40 = math.exp %39 : vector<16x128xf32>
    %cst_18 = arith.constant 1.000000e+00 : f32
    %41 = vector.broadcast %cst_18 : f32 to vector<16x128xf32>
    %42 = arith.addf %41, %40 : vector<16x128xf32>
    %43 = arith.divf %41, %42 : vector<16x128xf32>
    %44 = arith.addf %33, %43 : vector<16x128xf32>
    %cst_19 = arith.constant 2.500000e-01 : f32
    %45 = vector.broadcast %cst_19 : f32 to vector<16x128xf32>
    %46 = arith.mulf %44, %45 : vector<16x128xf32>
    %47 = arith.truncf %46 : vector<16x128xf32> to vector<16x128xbf16>
    %c0_20 = arith.constant 0 : index
    %c0_21 = arith.constant 0 : index
    %48 = vector.load %arg4[%c0_20, %c0_21] : memref<16x128xbf16, #tpu.memory_space<vmem>>, vector<16x128xbf16>
    tpu.vector_store %arg4[%c0_20, %c0_21], %47 {strides = array<i32>} : memref<16x128xbf16, #tpu.memory_space<vmem>>, vector<16x128xbf16>,
    return
  }
  func.func @transform_0(%arg0: i32) -> (i32, i32, i32) {
    %c0_i32 = arith.constant 0 : i32
    %c0_i32_0 = arith.constant 0 : i32
    %c0_i32_1 = arith.constant 0 : i32
    %c0_i32_2 = arith.constant 0 : i32
    return %c0_i32, %c0_i32_0, %c0_i32_1 : i32, i32, i32
  }
  func.func @transform_1(%arg0: i32) -> (i32, i32) {
    %c0_i32 = arith.constant 0 : i32
    %c0_i32_0 = arith.constant 0 : i32
    %c0_i32_1 = arith.constant 0 : i32
    return %c0_i32, %c0_i32_0 : i32, i32
  }
  func.func @transform_2(%arg0: i32) -> (i32, i32) {
    %c0_i32 = arith.constant 0 : i32
    %c0_i32_0 = arith.constant 0 : i32
    return %c0_i32, %arg0 : i32, i32
  }
  func.func @transform_3(%arg0: i32) -> (i32, i32) {
    %c0_i32 = arith.constant 0 : i32
    %c0_i32_0 = arith.constant 0 : i32
    return %c0_i32, %arg0 : i32, i32
  }
}

module attributes {stable_mosaic.version = 11 : i64} {
  func.func @_fc_kernel(%arg0: i32, %arg1: memref<2x512xbf16, #tpu.memory_space<vmem>>, %arg2: memref<512x128xbf16, #tpu.memory_space<vmem>>, %arg3: memref<1x128xf32, #tpu.memory_space<vmem>>, %arg4: memref<128x128xbf16, #tpu.memory_space<vmem>>, %arg5: memref<1x128xf32, #tpu.memory_space<vmem>>, %arg6: memref<128x128xbf16, #tpu.memory_space<vmem>>, %arg7: memref<1x128xf32, #tpu.memory_space<vmem>>, %arg8: memref<2x128xf32, #tpu.memory_space<vmem>>) attributes {dimension_semantics = [#tpu.dimension_semantics<parallel>], iteration_bounds = array<i64: 1>, scalar_prefetch = 0 : i64, scratch_operands = 0 : i64, tpu.core_type = #tpu.core_type<tc>, window_params = [{transform_indices = @transform_0, window_bounds = array<i64: 2, 512>}, {pipeline_mode = #tpu.pipeline_mode<synchronous>, transform_indices = @transform_1, window_bounds = array<i64: 512, 128>}, {pipeline_mode = #tpu.pipeline_mode<synchronous>, transform_indices = @transform_2, window_bounds = array<i64: 1, 128>}, {pipeline_mode = #tpu.pipeline_mode<synchronous>, transform_indices = @transform_3, window_bounds = array<i64: 128, 128>}, {pipeline_mode = #tpu.pipeline_mode<synchronous>, transform_indices = @transform_4, window_bounds = array<i64: 1, 128>}, {pipeline_mode = #tpu.pipeline_mode<synchronous>, transform_indices = @transform_5, window_bounds = array<i64: 128, 128>}, {pipeline_mode = #tpu.pipeline_mode<synchronous>, transform_indices = @transform_6, window_bounds = array<i64: 1, 128>}, {transform_indices = @transform_7, window_bounds = array<i64: 2, 128>}]} {
    %c0 = arith.constant 0 : index
    %c0_0 = arith.constant 0 : index
    %0 = vector.load %arg1[%c0, %c0_0] : memref<2x512xbf16, #tpu.memory_space<vmem>>, vector<2x512xbf16>
    %c0_1 = arith.constant 0 : index
    %c0_2 = arith.constant 0 : index
    %1 = vector.load %arg2[%c0_1, %c0_2] : memref<512x128xbf16, #tpu.memory_space<vmem>>, vector<512x128xbf16>
    %cst = arith.constant dense<0.000000e+00> : vector<2x128xf32>
    %2 = tpu.matmul %0, %1, %cst {dimension_numbers = #tpu.dot_dimension_numbers<[1], [0], [0], [1], [0, 0, 1, 1], [], []>} : vector<2x512xbf16>, vector<512x128xbf16>, vector<2x128xf32> -> vector<2x128xf32>
    %c0_3 = arith.constant 0 : index
    %c0_4 = arith.constant 0 : index
    %3 = vector.load %arg3[%c0_3, %c0_4] : memref<1x128xf32, #tpu.memory_space<vmem>>, vector<1x128xf32>
    %4 = vector.broadcast %3 : vector<1x128xf32> to vector<2x128xf32>
    %5 = arith.addf %2, %4 : vector<2x128xf32>
    %6 = arith.negf %5 : vector<2x128xf32>
    %7 = math.exp %6 : vector<2x128xf32>
    %cst_5 = arith.constant 1.000000e+00 : f32
    %8 = vector.broadcast %cst_5 : f32 to vector<2x128xf32>
    %9 = arith.addf %8, %7 : vector<2x128xf32>
    %10 = arith.divf %8, %9 : vector<2x128xf32>
    %11 = arith.truncf %10 : vector<2x128xf32> to vector<2x128xbf16>
    %c0_6 = arith.constant 0 : index
    %c0_7 = arith.constant 0 : index
    %12 = vector.load %arg4[%c0_6, %c0_7] : memref<128x128xbf16, #tpu.memory_space<vmem>>, vector<128x128xbf16>
    %cst_8 = arith.constant dense<0.000000e+00> : vector<2x128xf32>
    %13 = tpu.matmul %11, %12, %cst_8 {dimension_numbers = #tpu.dot_dimension_numbers<[1], [0], [0], [1], [0, 0, 1, 1], [], []>} : vector<2x128xbf16>, vector<128x128xbf16>, vector<2x128xf32> -> vector<2x128xf32>
    %c0_9 = arith.constant 0 : index
    %c0_10 = arith.constant 0 : index
    %14 = vector.load %arg5[%c0_9, %c0_10] : memref<1x128xf32, #tpu.memory_space<vmem>>, vector<1x128xf32>
    %15 = vector.broadcast %14 : vector<1x128xf32> to vector<2x128xf32>
    %16 = arith.addf %13, %15 : vector<2x128xf32>
    %17 = arith.negf %16 : vector<2x128xf32>
    %18 = math.exp %17 : vector<2x128xf32>
    %cst_11 = arith.constant 1.000000e+00 : f32
    %19 = vector.broadcast %cst_11 : f32 to vector<2x128xf32>
    %20 = arith.addf %19, %18 : vector<2x128xf32>
    %21 = arith.divf %19, %20 : vector<2x128xf32>
    %22 = arith.truncf %21 : vector<2x128xf32> to vector<2x128xbf16>
    %c0_12 = arith.constant 0 : index
    %c0_13 = arith.constant 0 : index
    %23 = vector.load %arg6[%c0_12, %c0_13] : memref<128x128xbf16, #tpu.memory_space<vmem>>, vector<128x128xbf16>
    %cst_14 = arith.constant dense<0.000000e+00> : vector<2x128xf32>
    %24 = tpu.matmul %22, %23, %cst_14 {dimension_numbers = #tpu.dot_dimension_numbers<[1], [0], [0], [1], [0, 0, 1, 1], [], []>} : vector<2x128xbf16>, vector<128x128xbf16>, vector<2x128xf32> -> vector<2x128xf32>
    %c0_15 = arith.constant 0 : index
    %c0_16 = arith.constant 0 : index
    %25 = vector.load %arg7[%c0_15, %c0_16] : memref<1x128xf32, #tpu.memory_space<vmem>>, vector<1x128xf32>
    %26 = vector.broadcast %25 : vector<1x128xf32> to vector<2x128xf32>
    %27 = arith.addf %24, %26 : vector<2x128xf32>
    %c0_17 = arith.constant 0 : index
    %c0_18 = arith.constant 0 : index
    %28 = vector.load %arg8[%c0_17, %c0_18] : memref<2x128xf32, #tpu.memory_space<vmem>>, vector<2x128xf32>
    tpu.vector_store %arg8[%c0_17, %c0_18], %27 {strides = array<i32>} : memref<2x128xf32, #tpu.memory_space<vmem>>, vector<2x128xf32>,
    return
  }
  func.func @transform_0(%arg0: i32) -> (i32, i32) {
    %c0_i32 = arith.constant 0 : i32
    %c0_i32_0 = arith.constant 0 : i32
    return %arg0, %c0_i32 : i32, i32
  }
  func.func @transform_1(%arg0: i32) -> (i32, i32) {
    %c0_i32 = arith.constant 0 : i32
    %c0_i32_0 = arith.constant 0 : i32
    %c0_i32_1 = arith.constant 0 : i32
    return %c0_i32, %c0_i32_0 : i32, i32
  }
  func.func @transform_2(%arg0: i32) -> (i32, i32) {
    %c0_i32 = arith.constant 0 : i32
    %c0_i32_0 = arith.constant 0 : i32
    %c0_i32_1 = arith.constant 0 : i32
    return %c0_i32, %c0_i32_0 : i32, i32
  }
  func.func @transform_3(%arg0: i32) -> (i32, i32) {
    %c0_i32 = arith.constant 0 : i32
    %c0_i32_0 = arith.constant 0 : i32
    %c0_i32_1 = arith.constant 0 : i32
    return %c0_i32, %c0_i32_0 : i32, i32
  }
  func.func @transform_4(%arg0: i32) -> (i32, i32) {
    %c0_i32 = arith.constant 0 : i32
    %c0_i32_0 = arith.constant 0 : i32
    %c0_i32_1 = arith.constant 0 : i32
    return %c0_i32, %c0_i32_0 : i32, i32
  }
  func.func @transform_5(%arg0: i32) -> (i32, i32) {
    %c0_i32 = arith.constant 0 : i32
    %c0_i32_0 = arith.constant 0 : i32
    %c0_i32_1 = arith.constant 0 : i32
    return %c0_i32, %c0_i32_0 : i32, i32
  }
  func.func @transform_6(%arg0: i32) -> (i32, i32) {
    %c0_i32 = arith.constant 0 : i32
    %c0_i32_0 = arith.constant 0 : i32
    %c0_i32_1 = arith.constant 0 : i32
    return %c0_i32, %c0_i32_0 : i32, i32
  }
  func.func @transform_7(%arg0: i32) -> (i32, i32) {
    %c0_i32 = arith.constant 0 : i32
    %c0_i32_0 = arith.constant 0 : i32
    return %arg0, %c0_i32 : i32, i32
  }
}

</mosaic_0001>

<bundles_post_ra>
// kernel: lenet_forward.3
= control target key start
LH: loop header
LB: loop body
LE: loop exit
PB: predicated region body
PF: predicated region fallthrough
CT: control target
= control target key end

     0   :  { %s816_s12 = smov 0   ;;  %s818_s13 = smov 0   ;;  %s1083_s0 = inlined_call_operand.vmem [shape: bf16[4,6,64], index: 0, kind: input, shape index: {}]   ;;  %s1084_s1 = inlined_call_operand.vmem [shape: f32[6,1], index: 1, kind: input, shape index: {}]   ;;  %s1085_s2 = inlined_call_operand.vmem [shape: bf16[64,512], index: 2, kind: input, shape index: {}]   ;;  %s1086_s3 = inlined_call_operand.vmem [shape: bf16[6,512], index: 3, kind: output, shape index: {}]  }
   0x1   :  { %s820_s14 = smov 0  }
   0x2 LB: > { %s640_s15 = sadd.s32 4294967295, %s793_s14   ;;  %s833_s16 = sadd.s32 1, %s793_s14   ;;  %s793_s14 = sphi %s820_s14, %s1113_s14   ;;  %s789_s13 = sphi %s818_s13, %s1112_s13   ;;  %s785_s12 = sphi %s816_s12, %s1111_s12  }
   0x3   : > { %s59_s17 = ssub.s32 %s793_s14, %s833_s16  ;;  %s62_s18 = sadd.s32 1, %s789_s13 }
   0x4   : > { %p60_p0 = scmp.eq.s32.totalorder %s59_s17, 0  ;;  %p69_p1 = scmp.ne.s32.totalorder %s789_s13, %s785_s12 }
   0x5   : > { %p70_p2 = scmp.eq.s32.totalorder %s793_s14, 0  ;;  %p643_p4 = scmp.ge.s32.totalorder %s793_s14, 2 }
   0x6   : > { %s842_s19 = scalar_select %p60_p0, %s789_s13, %s62_s18  }
   0x7   : > { %p71_p3 = por %p70_p2, %p69_p1  ;;  %127 = sbr.rel (%p643_p4) target bundleno = 24 (0x18), region = 24 }
   0xc   : > { %130 = sbr.rel (!%p71_p3) target bundleno = 24 (0x18), region = 28  ;;  %s132_s20 = sand.u32 (%p71_p3), 1, %s789_s13  }
   0xd   : > { %s704_s21 = sshll.u32 (%p71_p3), %s793_s14, 3  ;;  %s644_s22 = sshll.u32 (%p71_p3), %s132_s20, 6 }
   0xe   : > { %s137_s25 = scalar_lea.vmem (%p71_p3), %s1085_s2, %s704_s21  ;;  %s134_s26 = scalar_lea.vmem (%p71_p3), [#allocation2], %s644_s22 }
   0xf   : > { %v180_v0 = vld [vmem:[%s137_s25] sm:$0xff] (%p71_p3)  ;;  %v182_v1 = vld [vmem:[%s137_s25 + $0x10] sm:$0xff] (%p71_p3) }
  0x10   : > { %v184_v2 = vld [vmem:[%s137_s25 + $0x20] sm:$0xff] (%p71_p3)  ;;  %181 = vst [vmem:[%s134_s26] sm:$0xff] (%p71_p3), %v180_v0  ;;  %v186_v3 = vld [vmem:[%s137_s25 + $0x30] sm:$0xff] (%p71_p3) }
  0x11   : > { %183 = vst [vmem:[%s134_s26 + $0x8] sm:$0xff] %v182_v1  ;;  %v188_v4 = vld [vmem:[%s137_s25 + $0x40] sm:$0xff]  ;;  %v190_v5 = vld [vmem:[%s137_s25 + $0x50] sm:$0xff] }
  0x12   : > { %185 = vst [vmem:[%s134_s26 + $0x10] sm:$0xff] %v184_v2  ;;  %v192_v6 = vld [vmem:[%s137_s25 + $0x60] sm:$0xff]  ;;  %v194_v7 = vld [vmem:[%s137_s25 + $0x70] sm:$0xff] }
  0x13   : > { %187 = vst [vmem:[%s134_s26 + $0x18] sm:$0xff] %v186_v3 }
  0x14   : > { %189 = vst [vmem:[%s134_s26 + $0x20] sm:$0xff] %v188_v4 }
  0x15   : > { %191 = vst [vmem:[%s134_s26 + $0x28] sm:$0xff] %v190_v5 }
  0x16   : > { %193 = vst [vmem:[%s134_s26 + $0x30] sm:$0xff] %v192_v6 }
  0x17   : > { %195 = vst [vmem:[%s134_s26 + $0x38] sm:$0xff] %v194_v7 }
  0x18 PF: > { %p647_p5 = scmp.ge.s32.totalorder %s793_s14, 1  ;;  %p200_p6 = scmp.lt.s32.totalorder %s793_s14, 3 }
  0x1a   : > { %p201_p7 = pnand %p647_p5, %p200_p6 }
  0x1b   : > { %s207_s27 = sand.u32 (!%p201_p7), 1, %s785_s12   ;;  %s1029_s17 = sshll.u32 (!%p201_p7), %s640_s15, 1 }
  0x1c   : > { %204 = sbr.rel (%p201_p7) target bundleno = 240 (0xf0), region = 66  ;;  %s648_s28 = sshll.u32 (!%p201_p7), %s207_s27, 6 }
  0x1d   : > { %s856_s4 = scalar_lea.vmem (!%p201_p7), [#allocation2], %s648_s28  ;;  %p232_p8 = scmp.lt.s32.totalorder (!%p201_p7), %s1029_s17, 3 }
  0x21   : > { %v246_v8 = vld [vmem:[%s1084_s1] sm:$0x3f]  ;;  %v795_v9 = vmov 0   ;;  %v677_v10 = vld [vmem:[%s856_s4 + $0x30] sm:$0xf]  ;;  %vm293_vm0 = vcmask 523264  }
  0x22   : > { %738 = vset.pattern.permute.xlu0 %v795_v9  ;;  %v712_v11 = vld [vmem:[%s856_s4 + $0x34] sm:$0xf0]  ;;  %v711_v12 = vld [vmem:[%s856_s4 + $0x34] sm:$0xf]  ;;  %v679_v14 = vld [vmem:[%s856_s4 + $0x38] sm:$0xf0] }
  0x23   : > { %250 = vperm.xlu0 %738, %v246_v8   ;;  %v678_v13 = vor.u32 %v712_v11, %v677_v10  ;;  %v669_v15 = vld [vmem:[%s856_s4 + $0x20] sm:$0xf]  ;;  %v710_v16 = vld [vmem:[%s856_s4 + $0x24] sm:$0xf0]  ;;  %v682_v17 = vor.u32 %v711_v12, %v679_v14  ;;  %v709_v18 = vld [vmem:[%s856_s4 + $0x24] sm:$0xf] }
  0x24   : > { %v671_v19 = vld [vmem:[%s856_s4 + $0x28] sm:$0xf0]  ;;  %v670_v20 = vor.u32 %v710_v16, %v669_v15  ;;  %v661_v22 = vld [vmem:[%s856_s4 + $0x10] sm:$0xf]  ;;  %v708_v23 = vld [vmem:[%s856_s4 + $0x14] sm:$0xf0] }
  0x25   : > { %301 = vmatpush.bf16.msra.mxu0 %v678_v13  ;;  %370 = vmatpush.bf16.msra.mxu2 %v678_v13  ;;  %v674_v21 = vor.u32 %v709_v18, %v671_v19  ;;  %v707_v24 = vld [vmem:[%s856_s4 + $0x14] sm:$0xf]  ;;  %v663_v25 = vld [vmem:[%s856_s4 + $0x18] sm:$0xf0]  ;;  %v662_v26 = vor.u32 %v708_v23, %v661_v22  ;;  %v653_v28 = vld [vmem:[%s856_s4] sm:$0xf] }
  0x26   : > { %314 = vmatpush.bf16.msra.mxu1 %v682_v17  ;;  %383 = vmatpush.bf16.msra.mxu3 %v682_v17  ;;  %v666_v27 = vor.u32 %v707_v24, %v663_v25  ;;  %v706_v29 = vld [vmem:[%s856_s4 + $0x4] sm:$0xf0]  ;;  %v705_v30 = vld [vmem:[%s856_s4 + $0x4] sm:$0xf]  ;;  %v655_v31 = vld [vmem:[%s856_s4 + $0x8] sm:$0xf0] }
  0x27   : > { %v654_v32 = vor.u32 %v706_v29, %v653_v28  ;;  %v658_v33 = vor.u32 %v705_v30, %v655_v31  ;;  %v247_v34 = vld [vmem:[%s1083_s0] sm:$0x7]  ;;  %v687_v35 = vld [vmem:[%s1083_s0 + $0x4] sm:$0x7]  ;;  %v697_v36 = vld [vmem:[%s1083_s0 + $0xc] sm:$0x7] }
  0x28   : > { %v692_v37 = vld [vmem:[%s1083_s0 + $0x8] sm:$0x7]  ;;  %s1115_s17 = smov (!%p232_p8, %s1029_s17), 3 }
  0x29   : > { %302 = vmatpush.bf16.msra.mxu0 %v670_v20  ;;  %371 = vmatpush.bf16.msra.mxu2 %v670_v20  ;;  %s650_s14 = sshll.u32 %s1115_s17, 2 }
  0x2a   : > { %315 = vmatpush.bf16.msra.mxu1 %v674_v21  ;;  %384 = vmatpush.bf16.msra.mxu3 %v674_v21  ;;  %s235_s20 = scalar_lea.vmem %s1086_s3, %s650_s14 }
  0x2d   : > { %303 = vmatpush.bf16.msra.mxu0 %v662_v26  ;;  %372 = vmatpush.bf16.msra.mxu2 %v662_v26 }
  0x2e   : > { %316 = vmatpush.bf16.msra.mxu1 %v666_v27  ;;  %385 = vmatpush.bf16.msra.mxu3 %v666_v27 }
  0x31   : > { %304 = vmatpush.bf16.msra.mxu0 %v654_v32  ;;  %373 = vmatpush.bf16.msra.mxu2 %v654_v32 }
  0x32   : > { %317 = vmatpush.bf16.msra.mxu1 %v658_v33  ;;  %386 = vmatpush.bf16.msra.mxu3 %v658_v33 }
  0x34   : > { %683 = vmatmul.msk.bf16.vlgmr.msra.gmra.mxu0 %vm293_vm0, %v247_v34  ;;  %688 = vmatmul.msk.bf16.vlgmr.msra.gmra.mxu2 %vm293_vm0, %v687_v35 }
  0x35   : > { %512 = vmatpush.bf16.msrb.mxu2 %v678_v13  ;;  %684 = vmatmul.msk.bf16.vlgmr.msra.gmra.mxu1 %vm293_vm0, %v247_v34 }
  0x36   : > { %525 = vmatpush.bf16.msrb.mxu3 %v682_v17  ;;  %441 = vmatpush.bf16.msrb.mxu0 %v678_v13 }
  0x37   : > { %689 = vmatmul.msk.bf16.vlgmr.msra.gmra.mxu3 %vm293_vm0, %v687_v35  ;;  %454 = vmatpush.bf16.msrb.mxu1 %v682_v17 }
  0x39   : > { %513 = vmatpush.bf16.msrb.mxu2 %v670_v20 }
  0x3a   : > { %526 = vmatpush.bf16.msrb.mxu3 %v674_v21  ;;  %442 = vmatpush.bf16.msrb.mxu0 %v670_v20 }
  0x3b   : > { %455 = vmatpush.bf16.msrb.mxu1 %v674_v21 }
  0x3d   : > { %514 = vmatpush.bf16.msrb.mxu2 %v662_v26 }
  0x3e   : > { %527 = vmatpush.bf16.msrb.mxu3 %v666_v27  ;;  %443 = vmatpush.bf16.msrb.mxu0 %v662_v26 }
  0x3f   : > { %456 = vmatpush.bf16.msrb.mxu1 %v666_v27 }
  0x41   : > { %515 = vmatpush.bf16.msrb.mxu2 %v654_v32 }
  0x42   : > { %528 = vmatpush.bf16.msrb.mxu3 %v658_v33  ;;  %444 = vmatpush.bf16.msrb.mxu0 %v654_v32 }
  0x43   : > { %457 = vmatpush.bf16.msrb.mxu1 %v658_v33 }
  0x44   : > { %698 = vmatmul.msk.bf16.vlgmr.msrb.gmra.mxu2 %vm293_vm0, %v697_v36 }
  0x45   : > { %693 = vmatmul.msk.bf16.vlgmr.msrb.gmra.mxu0 %vm293_vm0, %v692_v37 }
  0x46   : > { %694 = vmatmul.msk.bf16.vlgmr.msrb.gmra.mxu1 %vm293_vm0, %v692_v37 }
  0x47   : > { %699 = vmatmul.msk.bf16.vlgmr.msrb.gmra.mxu3 %vm293_vm0, %v697_v36 }
  0x95   : > { %v251_v38 = vpop.permute.xlu0 %250 }
  0xb1   : > { %v306_v39 = vpop.f32.mrf.mxu0 }
  0xb2   : > { %v307_v40 = vadd.f32 %v306_v39, %v251_v38  ;;  %v319_v41 = vpop.f32.mrf.mxu1 }
  0xb3   : > { %v320_v42 = vadd.f32 %v319_v41, %v251_v38 }
  0xb4   : > { %v685_v43 = vmul.f32 -1.442695, %v307_v40 }
  0xb5   : > { %v686_v44 = vmul.f32 -1.442695, %v320_v42 }
  0xb6   : > { %739 = vpow2.f32 %v685_v43 }
  0xb7   : > { %741 = vpow2.f32 %v686_v44  ;;  %v375_v45 = vpop.f32.mrf.mxu2 }
  0xb8   : > { %v376_v46 = vadd.f32 %v375_v45, %v251_v38 }
  0xb9   : > { %v308_v49 = vpop.f32.mrf.mxu0 }
  0xba   : > { %v388_v47 = vpop.f32.mrf.mxu3  ;;  %v690_v50 = vmul.f32 -1.442695, %v376_v46  ;;  %v321_v51 = vpop.f32.mrf.mxu1 }
  0xbb   : > { %v389_v48 = vadd.f32 %v388_v47, %v251_v38 }
  0xbc   : > { %v740_v53 = vpop.eup %739  ;;  %743 = vpow2.f32 %v690_v50 }
  0xbd   : > { %v691_v52 = vmul.f32 -1.442695, %v389_v48  ;;  %v742_v54 = vpop.eup %741  ;;  %v894_v55 = vadd.f32 1.0, %v740_v53 }
  0xbe   : > { %v896_v56 = vadd.f32 1.0, %v742_v54 }
  0xbf   : > { %745 = vpow2.f32 %v691_v52  ;;  %v377_v57 = vpop.f32.mrf.mxu2  ;;  %v340_v25 = vand.u32 2147483647, %v894_v55  ;;  %v342_v26 = vand.u32 2147483648, %v894_v55  ;;  %vm336_vm1 = vweird.f32 %v894_v55 }
  0xc0   : > { %747 = vrcp.f32 %v894_v55  ;;  %v355_v33 = vand.u32 2147483647, %v896_v56  ;;  %v357_v34 = vand.u32 2147483648, %v896_v56  ;;  %vm351_vm2 = vweird.f32 %v896_v56 }
  0xc1   : > { %749 = vrcp.f32 %v896_v56  ;;  %vm936_vm4 = vcmp.eq.f32.partialorder %v340_v25, 8.507059e+37  ;;  %v343_v39 = vor.u32 1.1754944e-38, %v342_v26 }
  0xc2   : > { %v390_v58 = vpop.f32.mrf.mxu3  ;;  %v744_v59 = vpop.eup %743  ;;  %vm945_vm6 = vcmp.eq.f32.partialorder %v355_v33, 8.507059e+37  ;;  %v358_v45 = vor.u32 1.1754944e-38, %v357_v34 }
  0xc3   : > { %v446_v60 = vpop.f32.mrf.mxu0  ;;  %v459_v61 = vpop.f32.mrf.mxu1  ;;  %v900_v63 = vadd.f32 1.0, %v744_v59 }
  0xc4   : > { %v447_v1 = vadd.f32 %v446_v60, %v251_v38  ;;  %v460_v3 = vadd.f32 %v459_v61, %v251_v38 }
  0xc5   : > { %v746_v62 = vpop.eup %745  ;;  %751 = vrcp.f32 %v900_v63  ;;  %v409_v46 = vand.u32 2147483647, %v900_v63  ;;  %v411_v49 = vand.u32 2147483648, %v900_v63  ;;  %vm405_vm9 = vweird.f32 %v900_v63 }
  0xc6   : > { %v902_v0 = vadd.f32 1.0, %v746_v62  ;;  %v904_v2 = vpop.eup %747  ;;  %v695_v6 = vmul.f32 -1.442695, %v447_v1  ;;  %v696_v9 = vmul.f32 -1.442695, %v460_v3 }
  0xc7   : > { %v907_v4 = vpop.eup %749  ;;  %v517_v5 = vpop.f32.mrf.mxu2  ;;  %v332_v7 = vmul.f32 %v904_v2, %v894_v55  ;;  %vm337_vm3 = vweird.f32 %v904_v2  ;;  %vm985_vm13 = vcmp.eq.f32.partialorder %v409_v46, 8.507059e+37  ;;  %v412_v1 = vor.u32 1.1754944e-38, %v411_v49 }
  0xc8   : > { %753 = vrcp.f32 %v902_v0  ;;  %v347_v8 = vmul.f32 %v907_v4, %v896_v56  ;;  %v518_v10 = vadd.f32 %v517_v5, %v251_v38  ;;  %vm352_vm5 = vweird.f32 %v907_v4  ;;  %vm953_vm7 = vmor %vm336_vm1, %vm337_vm3 }
  0xc9   : > { %755 = vpow2.f32 %v695_v6  ;;  %v333_v18 = vsub.f32 1.0, %v332_v7  ;;  %v424_v50 = vand.u32 2147483647, %v902_v0  ;;  %vm965_vm8 = vmor %vm351_vm2, %vm352_vm5  ;;  %vm420_vm11 = vweird.f32 %v902_v0 }
  0xca   : > { %v530_v11 = vpop.f32.mrf.mxu3  ;;  %757 = vpow2.f32 %v696_v9  ;;  %v700_v15 = vmul.f32 -1.442695, %v518_v10  ;;  %v348_v19 = vsub.f32 1.0, %v347_v8  ;;  %v426_v54 = vand.u32 2147483648, %v902_v0 }
  0xcb   : > { %v448_v12 = vpop.f32.mrf.mxu0  ;;  %v461_v13 = vpop.f32.mrf.mxu1  ;;  %v531_v16 = vadd.f32 %v530_v11, %v251_v38  ;;  %v334_v28 = vmul.f32 %v904_v2, %v333_v18  ;;  %vm989_vm14 = vcmp.eq.f32.partialorder %v424_v50, 8.507059e+37 }
  0xcc   : > { %v914_v14 = vpop.eup %751  ;;  %759 = vpow2.f32 %v700_v15  ;;  %v349_v29 = vmul.f32 %v907_v4, %v348_v19  ;;  %v427_v7 = vor.u32 1.1754944e-38, %v426_v54 }
  0xcd   : > { %v401_v20 = vmul.f32 %v914_v14, %v900_v63  ;;  %v701_v22 = vmul.f32 -1.442695, %v531_v16  ;;  %v335_v40 = vadd.f32 %v904_v2, %v334_v28  ;;  %vm406_vm10 = vweird.f32 %v914_v14 }
  0xce   : > { %v916_v17 = vpop.eup %753  ;;  %v350_v41 = vadd.f32 %v907_v4, %v349_v29  ;;  %vm1002_vm15 = vmor %vm405_vm9, %vm406_vm10 }
  0xcf   : > { %v416_v21 = vmul.f32 %v916_v17, %v902_v0  ;;  %v519_v23 = vpop.f32.mrf.mxu2  ;;  %v756_v24 = vpop.eup %755  ;;  %761 = vpow2.f32 %v701_v22  ;;  %v402_v30 = vsub.f32 1.0, %v401_v20  ;;  %v339_v57 = vsel %vm953_vm7, %v904_v2, %v335_v40 }
  0xd0   : > { %v758_v27 = vpop.eup %757  ;;  %v926_v31 = vadd.f32 1.0, %v756_v24  ;;  %v354_v56 = vsel %vm965_vm8, %v907_v4, %v350_v41  ;;  %vm421_vm12 = vweird.f32 %v916_v17  ;;  %v344_v4 = vsel %vm936_vm4, %v343_v39, %v339_v57 }
  0xd1   : > { %v417_v35 = vsub.f32 1.0, %v416_v21  ;;  %v930_v36 = vadd.f32 1.0, %v758_v27  ;;  %v403_v42 = vmul.f32 %v914_v14, %v402_v30  ;;  %v359_v5 = vsel %vm945_vm6, %v358_v45, %v354_v56  ;;  %vm1011_vm0 = vmor %vm420_vm11, %vm421_vm12 }
  0xd2   : > { %v532_v32 = vpop.f32.mrf.mxu3  ;;  %763 = vrcp.f32 %v926_v31  ;;  %v760_v37 = vpop.eup %759  ;;  %v480_v11 = vand.u32 2147483647, %v926_v31  ;;  %v482_v63 = vand.u32 2147483648, %v926_v31  ;;  %vm476_vm2 = vweird.f32 %v926_v31 }
  0xd3   : > { %765 = vrcp.f32 %v930_v36  ;;  %v418_v47 = vmul.f32 %v916_v17, %v417_v35  ;;  %v959_v51 = vadd.f32 1.0, %v760_v37  ;;  %v404_v58 = vadd.f32 %v914_v14, %v403_v42 }
  0xd4   : > { %v497_v18 = vand.u32 2147483648, %v930_v36  ;;  %vm491_vm4 = vweird.f32 %v930_v36  ;;  %vm1037_vm6 = vcmp.eq.f32.partialorder %v480_v11, 8.507059e+37  ;;  %v483_v28 = vor.u32 1.1754944e-38, %v482_v63 }
  0xd5   : > { %v762_v43 = vpop.eup %761  ;;  %767 = vrcp.f32 %v959_v51  ;;  %v419_v60 = vadd.f32 %v916_v17, %v418_v47  ;;  %v408_v9 = vsel %vm1002_vm15, %v914_v14, %v404_v58  ;;  %v495_v14 = vand.u32 2147483647, %v930_v36 }
  0xd6   : > { %v961_v52 = vadd.f32 1.0, %v762_v43  ;;  %v413_v20 = vsel %vm985_vm13, %v412_v1, %v408_v9  ;;  %v498_v33 = vor.u32 1.1754944e-38, %v497_v18  ;;  %v553_v34 = vand.u32 2147483648, %v959_v51 }
  0xd7   : > { %v423_v13 = vsel %vm1011_vm0, %v916_v17, %v419_v60  ;;  %vm1049_vm8 = vcmp.eq.f32.partialorder %v495_v14, 8.507059e+37  ;;  %v551_v37 = vand.u32 2147483647, %v959_v51  ;;  %v430_v42 = vadd.f32 %v413_v20, %v344_v4 }
  0xd8   : > { %v764_v55 = vpop.eup %763  ;;  %769 = vrcp.f32 %v961_v52  ;;  %v428_v22 = vsel %vm989_vm14, %v427_v7, %v423_v13  ;;  %v568_v38 = vand.u32 2147483648, %v961_v52  ;;  %v566_v41 = vand.u32 2147483647, %v961_v52 }
  0xd9   : > { %v766_v59 = vpop.eup %765  ;;  %v472_v61 = vmul.f32 %v764_v55, %v926_v31  ;;  %vm477_vm1 = vweird.f32 %v764_v55  ;;  %vm547_vm11 = vweird.f32 %v959_v51  ;;  %v431_v45 = vadd.f32 %v428_v22, %v359_v5 }
  0xda   : > { %v487_v3 = vmul.f32 %v766_v59, %v930_v36  ;;  %vm492_vm3 = vweird.f32 %v766_v59  ;;  %vm1033_vm5 = vmor %vm476_vm2, %vm477_vm1  ;;  %v554_v46 = vor.u32 1.1754944e-38, %v553_v34  ;;  %vm562_vm13 = vweird.f32 %v961_v52 }
  0xdb   : > { %v473_v8 = vsub.f32 1.0, %v472_v61  ;;  %v768_v16 = vpop.eup %767  ;;  %vm1045_vm7 = vmor %vm491_vm4, %vm492_vm3  ;;  %vm552_vm14 = vcmp.eq.f32.partialorder %v551_v37, 8.507059e+37  ;;  %v569_v50 = vor.u32 1.1754944e-38, %v568_v38  ;;  %vm567_vm0 = vcmp.eq.f32.partialorder %v566_v41, 8.507059e+37 }
  0xdc   : > { %v488_v12 = vsub.f32 1.0, %v487_v3  ;;  %v543_v17 = vmul.f32 %v768_v16, %v959_v51  ;;  %vm548_vm9 = vweird.f32 %v768_v16 }
  0xdd   : > { %v474_v15 = vmul.f32 %v764_v55, %v473_v8  ;;  %vm549_vm12 = vmor %vm547_vm11, %vm548_vm9 }
  0xde   : > { %v489_v0 = vmul.f32 %v766_v59, %v488_v12  ;;  %v770_v19 = vpop.eup %769  ;;  %v544_v31 = vsub.f32 1.0, %v543_v17 }
  0xdf   : > { %v475_v21 = vadd.f32 %v764_v55, %v474_v15  ;;  %v558_v26 = vmul.f32 %v770_v19, %v961_v52  ;;  %vm563_vm10 = vweird.f32 %v770_v19 }
  0xe0   : > { %v490_v25 = vadd.f32 %v766_v59, %v489_v0  ;;  %v545_v36 = vmul.f32 %v768_v16, %v544_v31  ;;  %vm564_vm15 = vmor %vm562_vm13, %vm563_vm10 }
  0xe1   : > { %v479_v27 = vsel %vm1033_vm5, %v764_v55, %v475_v21  ;;  %v559_v35 = vsub.f32 1.0, %v558_v26 }
  0xe2   : > { %v494_v32 = vsel %vm1045_vm7, %v766_v59, %v490_v25  ;;  %v484_v39 = vsel %vm1037_vm6, %v483_v28, %v479_v27  ;;  %v546_v44 = vadd.f32 %v768_v16, %v545_v36 }
  0xe3   : > { %v560_v40 = vmul.f32 %v770_v19, %v559_v35  ;;  %v499_v43 = vsel %vm1049_vm8, %v498_v33, %v494_v32  ;;  %v501_v48 = vadd.f32 %v484_v39, %v430_v42 }
  0xe4   : > { %v550_v49 = vsel %vm549_vm12, %v768_v16, %v546_v44  ;;  %v502_v53 = vadd.f32 %v499_v43, %v431_v45 }
  0xe5   : > { %v561_v47 = vadd.f32 %v770_v19, %v560_v40  ;;  %v555_v54 = vsel %vm552_vm14, %v554_v46, %v550_v49 }
  0xe6   : > { %v572_v57 = vadd.f32 %v555_v54, %v501_v48 }
  0xe7   : > { %v565_v55 = vsel %vm564_vm15, %v770_v19, %v561_v47 }
  0xe8   : > { %v570_v51 = vsel %vm567_vm0, %v569_v50, %v565_v55  ;;  %v574_v58 = vmul.f32 0.25, %v572_v57 }
  0xe9   : > { %v573_v56 = vadd.f32 %v570_v51, %v502_v53 }
  0xeb   : > { %v575_v59 = vmul.f32 0.25, %v573_v56 }
  0xed   : > { %v576_v52 = vpack.c.bf16 %v575_v59, %v574_v58 }
  0xef   : > { %577 = vst [vmem:[%s235_s20] sm:$0x77] %v576_v52 }
  0xf0 PF: > { %p10_p9 = scmp.ge.s32.totalorder %s833_s16, 4   ;;  %s1111_s12 = smov %s789_s13 }
  0xf1   : > { %s1112_s13 = smov %s842_s19  ;;  %s1113_s14 = smov %s833_s16 }
  0xf2   :  { %12 = sbr.rel (!%p10_p9) target bundleno = 2 (0x2), region = 108 }

// kernel: lenet_forward.4
= control target key start
LH: loop header
LB: loop body
LE: loop exit
PB: predicated region body
PF: predicated region fallthrough
CT: control target
= control target key end

     0   :  { %v646_v8 = vmov 0   ;;  %vm150_vm0 = vcmask 785408   ;;  %s1029_s2 = inlined_call_operand.vmem [shape: bf16[224,128], index: 2, kind: input, shape index: {}]   ;;  %s1030_s1 = inlined_call_operand.vmem [shape: f32[16,1], index: 1, kind: input, shape index: {}]   ;;  %s1031_s0 = inlined_call_operand.vmem [shape: bf16[4,16,224], index: 0, kind: input, shape index: {}]   ;;  %s1032_s3 = inlined_call_operand.vmem [shape: bf16[16,128], index: 3, kind: output, shape index: {}]  }
   0x1   :  { %v670_v0 = vld [vmem:[%s1029_s2 + $0x38] sm:$0xff]  ;;  %v675_v1 = vld [vmem:[%s1029_s2 + $0x68] sm:$0xff]  ;;  %v682_v2 = vld [vmem:[%s1029_s2 + $0x30] sm:$0xff]  ;;  %613 = vset.pattern.permute.xlu0 %v646_v8 }
   0x2   :  { %154 = vmatpush.bf16.msra.mxu0 %v670_v0  ;;  %170 = vmatpush.bf16.msra.mxu1 %v675_v1  ;;  %v687_v3 = vld [vmem:[%s1029_s2 + $0x60] sm:$0xff]  ;;  %v696_v4 = vld [vmem:[%s1029_s2 + $0x28] sm:$0xff]  ;;  %v701_v5 = vld [vmem:[%s1029_s2 + $0x58] sm:$0xff] }
   0x3   :  { %235 = vmatpush.bf16.msra.mxu2 %v670_v0  ;;  %251 = vmatpush.bf16.msra.mxu3 %v675_v1  ;;  %v710_v6 = vld [vmem:[%s1029_s2 + $0x20] sm:$0xff]  ;;  %v715_v7 = vld [vmem:[%s1029_s2 + $0x50] sm:$0xff]  ;;  %v727_v10 = vld [vmem:[%s1029_s2 + $0x18] sm:$0xff] }
   0x4   :  { %v43_v9 = vld [vmem:[%s1030_s1] sm:$0xff]  ;;  %v732_v11 = vld [vmem:[%s1029_s2 + $0x48] sm:$0xff]  ;;  %v739_v12 = vld [vmem:[%s1029_s2 + $0x10] sm:$0xff] }
   0x5   :  { %49 = vperm.xlu0 %613, %v43_v9   ;;  %v746_v13 = vld [vmem:[%s1029_s2 + $0x40] sm:$0xff]  ;;  %v483_v15 = vld [vmem:[%s1031_s0 + $0x8] sm:$0xf0]  ;;  %v601_v17 = vld [vmem:[%s1031_s0 + $0x14] sm:$0xf] }
   0x6   :  { %155 = vmatpush.bf16.msra.mxu0 %v682_v2  ;;  %171 = vmatpush.bf16.msra.mxu1 %v687_v3  ;;  %v599_v14 = vld [vmem:[%s1031_s0 + $0x4] sm:$0xf]  ;;  %v44_v16 = vld [vmem:[%s1030_s1 + $0x8] sm:$0xff]  ;;  %v552_v18 = vld [vmem:[%s1031_s0 + $0x18] sm:$0xf0] }
   0x7   :  { %236 = vmatpush.bf16.msra.mxu2 %v682_v2  ;;  %252 = vmatpush.bf16.msra.mxu3 %v687_v3  ;;  %v486_v19 = vor.u32 %v599_v14, %v483_v15  ;;  %v586_v20 = vld [vmem:[%s1029_s2 + $0x8] sm:$0xff]  ;;  %v555_v21 = vor.u32 %v601_v17, %v552_v18  ;;  %v585_v22 = vld [vmem:[%s1029_s2] sm:$0xff]  ;;  %v550_v25 = vld [vmem:[%s1031_s0 + $0x10] sm:$0xf] }
   0x8   :  { %v481_v23 = vld [vmem:[%s1031_s0] sm:$0xf]  ;;  %v600_v24 = vld [vmem:[%s1031_s0 + $0x4] sm:$0xf0]  ;;  %v602_v26 = vld [vmem:[%s1031_s0 + $0x14] sm:$0xf0] }
   0x9   :  { %v482_v27 = vor.u32 %v600_v24, %v481_v23  ;;  %v551_v28 = vor.u32 %v602_v26, %v550_v25  ;;  %v603_v29 = vld [vmem:[%s1031_s0 + $0x24] sm:$0xf]  ;;  %v565_v30 = vld [vmem:[%s1031_s0 + $0x28] sm:$0xf0]  ;;  %v563_v32 = vld [vmem:[%s1031_s0 + $0x20] sm:$0xf] }
   0xa   :  { %156 = vmatpush.bf16.msra.mxu0 %v696_v4  ;;  %172 = vmatpush.bf16.msra.mxu1 %v701_v5  ;;  %v568_v31 = vor.u32 %v603_v29, %v565_v30  ;;  %v604_v33 = vld [vmem:[%s1031_s0 + $0x24] sm:$0xf0]  ;;  %v605_v34 = vld [vmem:[%s1031_s0 + $0x34] sm:$0xf]  ;;  %v578_v35 = vld [vmem:[%s1031_s0 + $0x38] sm:$0xf0] }
   0xb   :  { %237 = vmatpush.bf16.msra.mxu2 %v696_v4  ;;  %253 = vmatpush.bf16.msra.mxu3 %v701_v5  ;;  %v564_v36 = vor.u32 %v604_v33, %v563_v32  ;;  %v581_v37 = vor.u32 %v605_v34, %v578_v35  ;;  %v576_v38 = vld [vmem:[%s1031_s0 + $0x30] sm:$0xf]  ;;  %v606_v39 = vld [vmem:[%s1031_s0 + $0x34] sm:$0xf0] }
   0xc   :  { %v577_v40 = vor.u32 %v606_v39, %v576_v38 }
   0xd   :  { %54 = vperm.xlu0 %613, %v44_v16  }
   0xe   :  { %157 = vmatpush.bf16.msra.mxu0 %v710_v6  ;;  %173 = vmatpush.bf16.msra.mxu1 %v715_v7 }
   0xf   :  { %238 = vmatpush.bf16.msra.mxu2 %v710_v6  ;;  %254 = vmatpush.bf16.msra.mxu3 %v715_v7 }
  0x12   :  { %158 = vmatpush.bf16.msra.mxu0 %v727_v10  ;;  %174 = vmatpush.bf16.msra.mxu1 %v732_v11 }
  0x13   :  { %239 = vmatpush.bf16.msra.mxu2 %v727_v10  ;;  %255 = vmatpush.bf16.msra.mxu3 %v732_v11 }
  0x16   :  { %159 = vmatpush.bf16.msra.mxu0 %v739_v12  ;;  %175 = vmatpush.bf16.msra.mxu1 %v746_v13 }
  0x17   :  { %240 = vmatpush.bf16.msra.mxu2 %v739_v12  ;;  %256 = vmatpush.bf16.msra.mxu3 %v746_v13 }
  0x19   :  { %543 = vmatmul.msk.bf16.vlgmr.msra.gmra.mxu1 %vm150_vm0, %v486_v19 }
  0x1a   :  { %318 = vmatpush.bf16.msrb.mxu1 %v670_v0  ;;  %160 = vmatpush.bf16.msra.mxu0 %v586_v20 }
  0x1b   :  { %334 = vmatpush.bf16.msrb.mxu3 %v675_v1  ;;  %241 = vmatpush.bf16.msra.mxu2 %v586_v20 }
  0x1c   :  { %556 = vmatmul.msk.bf16.vlgmr.msra.gmra.mxu3 %vm150_vm0, %v555_v21 }
  0x1e   :  { %319 = vmatpush.bf16.msrb.mxu1 %v682_v2  ;;  %161 = vmatpush.bf16.msra.mxu0 %v585_v22 }
  0x1f   :  { %335 = vmatpush.bf16.msrb.mxu3 %v687_v3  ;;  %242 = vmatpush.bf16.msra.mxu2 %v585_v22 }
  0x21   :  { %162 = vmatmul.bf16.vlgmr.msra.gmra.mxu0 %v482_v27 }
  0x22   :  { %320 = vmatpush.bf16.msrb.mxu1 %v696_v4  ;;  %401 = vmatpush.bf16.msrb.mxu0 %v670_v0 }
  0x23   :  { %417 = vmatpush.bf16.msrb.mxu2 %v675_v1  ;;  %336 = vmatpush.bf16.msrb.mxu3 %v701_v5 }
  0x24   :  { %243 = vmatmul.bf16.vlgmr.msra.gmra.mxu2 %v551_v28 }
  0x26   :  { %321 = vmatpush.bf16.msrb.mxu1 %v710_v6  ;;  %402 = vmatpush.bf16.msrb.mxu0 %v682_v2 }
  0x27   :  { %418 = vmatpush.bf16.msrb.mxu2 %v687_v3  ;;  %337 = vmatpush.bf16.msrb.mxu3 %v715_v7 }
  0x2a   :  { %322 = vmatpush.bf16.msrb.mxu1 %v727_v10  ;;  %403 = vmatpush.bf16.msrb.mxu0 %v696_v4 }
  0x2b   :  { %419 = vmatpush.bf16.msrb.mxu2 %v701_v5  ;;  %338 = vmatpush.bf16.msrb.mxu3 %v732_v11 }
  0x2e   :  { %323 = vmatpush.bf16.msrb.mxu1 %v739_v12  ;;  %404 = vmatpush.bf16.msrb.mxu0 %v710_v6 }
  0x2f   :  { %420 = vmatpush.bf16.msrb.mxu2 %v715_v7  ;;  %339 = vmatpush.bf16.msrb.mxu3 %v746_v13 }
  0x32   :  { %324 = vmatpush.bf16.msrb.mxu1 %v586_v20  ;;  %405 = vmatpush.bf16.msrb.mxu0 %v727_v10 }
  0x33   :  { %421 = vmatpush.bf16.msrb.mxu2 %v732_v11  ;;  %569 = vmatmul.msk.bf16.vlgmr.msrb.gmra.mxu3 %vm150_vm0, %v568_v31 }
  0x36   :  { %325 = vmatpush.bf16.msrb.mxu1 %v585_v22  ;;  %406 = vmatpush.bf16.msrb.mxu0 %v739_v12 }
  0x37   :  { %422 = vmatpush.bf16.msrb.mxu2 %v746_v13 }
  0x39   :  { %326 = vmatmul.bf16.vlgmr.msrb.gmra.mxu1 %v564_v36 }
  0x3a   :  { %582 = vmatmul.msk.bf16.vlgmr.msrb.gmra.mxu2 %vm150_vm0, %v581_v37  ;;  %407 = vmatpush.bf16.msrb.mxu0 %v586_v20 }
  0x3e   :  { %408 = vmatpush.bf16.msrb.mxu0 %v585_v22 }
  0x41   :  { %409 = vmatmul.bf16.vlgmr.msrb.gmra.mxu0 %v577_v40 }
  0x77   :  { %v50_v41 = vpop.permute.xlu0 %49 }
  0x7f   :  { %v55_v49 = vpop.permute.xlu0 %54 }
  0x96   :  { %v177_v43 = vpop.f32.mrf.mxu1 }
  0x9e   :  { %v163_v42 = vpop.f32.mrf.mxu0  ;;  %v179_v54 = vpop.f32.mrf.mxu1 }
  0x9f   :  { %v258_v44 = vpop.f32.mrf.mxu3  ;;  %v164_v45 = vadd.f32 %v163_v42, %v50_v41 }
  0xa1   :  { %v178_v47 = vadd.f32 %v177_v43, %v164_v45 }
  0xa3   :  { %v544_v53 = vmul.f32 -1.442695, %v178_v47 }
  0xa5   :  { %614 = vpow2.f32 %v544_v53 }
  0xa6   :  { %v165_v50 = vpop.f32.mrf.mxu0 }
  0xa7   :  { %v244_v46 = vpop.f32.mrf.mxu2  ;;  %v166_v52 = vadd.f32 %v165_v50, %v55_v49  ;;  %v260_v55 = vpop.f32.mrf.mxu3 }
  0xa8   :  { %v245_v48 = vadd.f32 %v244_v46, %v50_v41 }
  0xa9   :  { %v180_v57 = vadd.f32 %v179_v54, %v166_v52 }
  0xaa   :  { %v259_v51 = vadd.f32 %v258_v44, %v245_v48 }
  0xab   :  { %v545_v60 = vmul.f32 -1.442695, %v180_v57  ;;  %v615_v63 = vpop.eup %614 }
  0xac   :  { %v557_v56 = vmul.f32 -1.442695, %v259_v51  ;;  %v839_v4 = vadd.f32 1.0, %v615_v63 }
  0xae   :  { %616 = vpow2.f32 %v557_v56  ;;  %v199_v42 = vand.u32 2147483647, %v839_v4  ;;  %v201_v44 = vand.u32 2147483648, %v839_v4  ;;  %vm195_vm1 = vweird.f32 %v839_v4 }
  0xaf   :  { %v246_v58 = vpop.f32.mrf.mxu2  ;;  %618 = vpow2.f32 %v545_v60 }
  0xb0   :  { %v247_v59 = vadd.f32 %v246_v58, %v55_v49  ;;  %vm885_vm2 = vcmp.eq.f32.partialorder %v199_v42, 8.507059e+37  ;;  %v202_v51 = vor.u32 1.1754944e-38, %v201_v44 }
  0xb2   :  { %v261_v61 = vadd.f32 %v260_v55, %v247_v59 }
  0xb4   :  { %v558_v0 = vmul.f32 -1.442695, %v261_v61  ;;  %v617_v3 = vpop.eup %616 }
  0xb5   :  { %v841_v6 = vadd.f32 1.0, %v617_v3  ;;  %v619_v8 = vpop.eup %618 }
  0xb6   :  { %v327_v62 = vpop.f32.mrf.mxu1  ;;  %v341_v2 = vpop.f32.mrf.mxu3  ;;  %620 = vpow2.f32 %v558_v0  ;;  %v845_v15 = vadd.f32 1.0, %v619_v8 }
  0xb7   :  { %v328_v1 = vadd.f32 %v327_v62, %v50_v41  ;;  %622 = vrcp.f32 %v839_v4  ;;  %v280_v52 = vand.u32 2147483647, %v841_v6  ;;  %vm276_vm4 = vweird.f32 %v841_v6 }
  0xb8   :  { %v282_v54 = vand.u32 2147483648, %v841_v6  ;;  %vm210_vm7 = vweird.f32 %v845_v15  ;;  %v214_v62 = vand.u32 2147483647, %v845_v15  ;;  %v216_v63 = vand.u32 2147483648, %v845_v15 }
  0xb9   :  { %v342_v5 = vadd.f32 %v341_v2, %v328_v1  ;;  %vm916_vm8 = vcmp.eq.f32.partialorder %v280_v52, 8.507059e+37 }
  0xba   :  { %vm953_vm14 = vcmp.eq.f32.partialorder %v214_v62, 8.507059e+37 }
  0xbb   :  { %v570_v7 = vmul.f32 -1.442695, %v342_v5 }
  0xbc   :  { %v621_v14 = vpop.eup %620 }
  0xbd   :  { %624 = vpow2.f32 %v570_v7  ;;  %v424_v16 = vpop.f32.mrf.mxu2  ;;  %v847_v19 = vpop.eup %622  ;;  %v849_v20 = vadd.f32 1.0, %v621_v14 }
  0xbe   :  { %v329_v9 = vpop.f32.mrf.mxu1  ;;  %v410_v11 = vpop.f32.mrf.mxu0  ;;  %626 = vrcp.f32 %v841_v6  ;;  %v191_v27 = vmul.f32 %v847_v19, %v839_v4  ;;  %vm196_vm3 = vweird.f32 %v847_v19 }
  0xbf   :  { %v330_v10 = vadd.f32 %v329_v9, %v55_v49  ;;  %v343_v12 = vpop.f32.mrf.mxu3  ;;  %v411_v13 = vadd.f32 %v410_v11, %v50_v41  ;;  %628 = vrcp.f32 %v845_v15  ;;  %vm904_vm6 = vmor %vm195_vm1, %vm196_vm3  ;;  %v295_v4 = vand.u32 2147483647, %v849_v20 }
  0xc0   :  { %v192_v33 = vsub.f32 1.0, %v191_v27  ;;  %v297_v9 = vand.u32 2147483648, %v849_v20  ;;  %vm291_vm11 = vweird.f32 %v849_v20 }
  0xc1   :  { %v344_v17 = vadd.f32 %v343_v12, %v330_v10  ;;  %v425_v18 = vadd.f32 %v424_v16, %v411_v13  ;;  %v283_v13 = vor.u32 1.1754944e-38, %v282_v54  ;;  %vm943_vm12 = vcmp.eq.f32.partialorder %v295_v4, 8.507059e+37 }
  0xc2   :  { %v193_v43 = vmul.f32 %v847_v19, %v192_v33 }
  0xc3   :  { %v571_v21 = vmul.f32 -1.442695, %v344_v17  ;;  %v583_v22 = vmul.f32 -1.442695, %v425_v18  ;;  %v625_v23 = vpop.eup %624  ;;  %v217_v17 = vor.u32 1.1754944e-38, %v216_v63 }
  0xc4   :  { %v852_v24 = vadd.f32 1.0, %v625_v23  ;;  %v854_v25 = vpop.eup %626  ;;  %v194_v50 = vadd.f32 %v847_v19, %v193_v43 }
  0xc5   :  { %630 = vpow2.f32 %v571_v21  ;;  %v272_v28 = vmul.f32 %v854_v25, %v841_v6  ;;  %v862_v30 = vpop.eup %628  ;;  %v426_v31 = vpop.f32.mrf.mxu2  ;;  %vm277_vm5 = vweird.f32 %v854_v25 }
  0xc6   :  { %632 = vpow2.f32 %v583_v22  ;;  %v412_v26 = vpop.f32.mrf.mxu0  ;;  %v206_v45 = vmul.f32 %v862_v30, %v845_v15  ;;  %v198_v2 = vsel %vm904_vm6, %v847_v19, %v194_v50  ;;  %vm925_vm9 = vmor %vm276_vm4, %vm277_vm5  ;;  %vm211_vm10 = vweird.f32 %v862_v30 }
  0xc7   :  { %634 = vrcp.f32 %v849_v20  ;;  %v413_v29 = vadd.f32 %v412_v26, %v55_v49  ;;  %v273_v38 = vsub.f32 1.0, %v272_v28  ;;  %v203_v16 = vsel %vm885_vm2, %v202_v51, %v198_v2  ;;  %vm965_vm1 = vmor %vm210_vm7, %vm211_vm10 }
  0xc8   :  { %636 = vrcp.f32 %v852_v24  ;;  %v207_v55 = vsub.f32 1.0, %v206_v45  ;;  %vm359_vm15 = vweird.f32 %v852_v24 }
  0xc9   :  { %v427_v34 = vadd.f32 %v426_v31, %v413_v29  ;;  %v274_v46 = vmul.f32 %v854_v25, %v273_v38  ;;  %v363_v31 = vand.u32 2147483647, %v852_v24 }
  0xca   :  { %v208_v8 = vmul.f32 %v862_v30, %v207_v55 }
  0xcb   :  { %v631_v32 = vpop.eup %630  ;;  %v584_v40 = vmul.f32 -1.442695, %v427_v34  ;;  %v275_v57 = vadd.f32 %v854_v25, %v274_v46 }
  0xcc   :  { %v633_v35 = vpop.eup %632  ;;  %v864_v36 = vadd.f32 1.0, %v631_v32  ;;  %v209_v23 = vadd.f32 %v862_v30, %v208_v8  ;;  %v365_v32 = vand.u32 2147483648, %v852_v24 }
  0xcd   :  { %v866_v37 = vpop.eup %634  ;;  %v868_v39 = vadd.f32 1.0, %v633_v35  ;;  %v279_v12 = vsel %vm925_vm9, %v854_v25, %v275_v57  ;;  %v298_v25 = vor.u32 1.1754944e-38, %v297_v9  ;;  %vm364_vm9 = vcmp.eq.f32.partialorder %v363_v31, 8.507059e+37 }
  0xce   :  { %v870_v41 = vpop.eup %636  ;;  %638 = vrcp.f32 %v864_v36  ;;  %v287_v47 = vmul.f32 %v866_v37, %v849_v20  ;;  %v284_v22 = vsel %vm916_vm8, %v283_v13, %v279_v12  ;;  %vm292_vm13 = vweird.f32 %v866_v37 }
  0xcf   :  { %640 = vrcp.f32 %v868_v39  ;;  %v355_v48 = vmul.f32 %v870_v41, %v852_v24  ;;  %vm360_vm0 = vweird.f32 %v870_v41  ;;  %v378_v33 = vand.u32 2147483647, %v864_v36  ;;  %vm975_vm3 = vmor %vm291_vm11, %vm292_vm13 }
  0xd0   :  { %642 = vpow2.f32 %v584_v40  ;;  %v288_v58 = vsub.f32 1.0, %v287_v47  ;;  %v380_v35 = vand.u32 2147483648, %v864_v36  ;;  %v213_v24 = vsel %vm965_vm1, %v862_v30, %v209_v23  ;;  %vm986_vm5 = vmor %vm359_vm15, %vm360_vm0 }
  0xd1   :  { %v356_v59 = vsub.f32 1.0, %v355_v48  ;;  %vm374_vm6 = vweird.f32 %v864_v36  ;;  %vm442_vm7 = vweird.f32 %v868_v39  ;;  %v448_v20 = vand.u32 2147483648, %v868_v39 }
  0xd2   :  { %v289_v14 = vmul.f32 %v866_v37, %v288_v58  ;;  %v301_v46 = vadd.f32 %v284_v22, %v203_v16  ;;  %v366_v47 = vor.u32 1.1754944e-38, %v365_v32  ;;  %vm379_vm10 = vcmp.eq.f32.partialorder %v378_v33, 8.507059e+37 }
  0xd3   :  { %v357_v6 = vmul.f32 %v870_v41, %v356_v59  ;;  %v381_v48 = vor.u32 1.1754944e-38, %v380_v35  ;;  %v449_v52 = vor.u32 1.1754944e-38, %v448_v20 }
  0xd4   :  { %v892_v53 = vpop.eup %638  ;;  %v290_v27 = vadd.f32 %v866_v37, %v289_v14 }
  0xd5   :  { %v897_v56 = vpop.eup %640  ;;  %v370_v60 = vmul.f32 %v892_v53, %v864_v36  ;;  %v358_v28 = vadd.f32 %v870_v41, %v357_v6  ;;  %vm375_vm2 = vweird.f32 %v892_v53  ;;  %v446_v36 = vand.u32 2147483647, %v868_v39 }
  0xd6   :  { %v438_v0 = vmul.f32 %v897_v56, %v868_v39  ;;  %v643_v1 = vpop.eup %642  ;;  %vm443_vm4 = vweird.f32 %v897_v56  ;;  %v294_v43 = vsel %vm975_vm3, %v866_v37, %v290_v27  ;;  %vm1001_vm8 = vmor %vm374_vm6, %vm375_vm2 }
  0xd7   :  { %v371_v5 = vsub.f32 1.0, %v370_v60  ;;  %v931_v11 = vadd.f32 1.0, %v643_v1  ;;  %v362_v44 = vsel %vm986_vm5, %v870_v41, %v358_v28  ;;  %vm1009_vm11 = vmor %vm442_vm7, %vm443_vm4  ;;  %v299_v50 = vsel %vm943_vm12, %v298_v25, %v294_v43 }
  0xd8   :  { %v439_v10 = vsub.f32 1.0, %v438_v0  ;;  %v367_v51 = vsel %vm364_vm9, %v366_v47, %v362_v44  ;;  %vm447_vm13 = vcmp.eq.f32.partialorder %v446_v36, 8.507059e+37 }
  0xd9   :  { %644 = vrcp.f32 %v931_v11  ;;  %v372_v19 = vmul.f32 %v892_v53, %v371_v5  ;;  %v463_v54 = vand.u32 2147483648, %v931_v11  ;;  %v461_v57 = vand.u32 2147483647, %v931_v11 }
  0xda   :  { %v440_v21 = vmul.f32 %v897_v56, %v439_v10  ;;  %v384_v60 = vadd.f32 %v367_v51, %v301_v46  ;;  %vm457_vm0 = vweird.f32 %v931_v11 }
  0xdb   :  { %v373_v15 = vadd.f32 %v892_v53, %v372_v19  ;;  %v464_v62 = vor.u32 1.1754944e-38, %v463_v54  ;;  %vm462_vm1 = vcmp.eq.f32.partialorder %v461_v57, 8.507059e+37 }
  0xdc   :  { %v441_v38 = vadd.f32 %v897_v56, %v440_v21 }
  0xdd   :  { %v377_v41 = vsel %vm1001_vm8, %v892_v53, %v373_v15  ;;  %v218_v53 = vsel %vm953_vm14, %v217_v17, %v213_v24 }
  0xde   :  { %v445_v39 = vsel %vm1009_vm11, %v897_v56, %v441_v38  ;;  %v382_v58 = vsel %vm379_vm10, %v381_v48, %v377_v41  ;;  %v302_v56 = vadd.f32 %v299_v50, %v218_v53 }
  0xdf   :  { %v645_v40 = vpop.eup %644  ;;  %v450_v59 = vsel %vm447_vm13, %v449_v52, %v445_v39 }
  0xe0   :  { %v453_v45 = vmul.f32 %v645_v40, %v931_v11  ;;  %vm458_vm15 = vweird.f32 %v645_v40  ;;  %v385_v63 = vadd.f32 %v382_v58, %v302_v56  ;;  %v467_v0 = vadd.f32 %v450_v59, %v384_v60 }
  0xe1   :  { %vm459_vm12 = vmor %vm457_vm0, %vm458_vm15 }
  0xe2   :  { %v454_v49 = vsub.f32 1.0, %v453_v45  ;;  %v469_v4 = vmul.f32 0.25, %v467_v0 }
  0xe4   :  { %v455_v55 = vmul.f32 %v645_v40, %v454_v49 }
  0xe6   :  { %v456_v61 = vadd.f32 %v645_v40, %v455_v55 }
  0xe8   :  { %v460_v1 = vsel %vm459_vm12, %v645_v40, %v456_v61 }
  0xe9   :  { %v465_v2 = vsel %vm462_vm1, %v464_v62, %v460_v1 }
  0xea   :  { %v468_v3 = vadd.f32 %v465_v2, %v385_v63 }
  0xec   :  { %v470_v5 = vmul.f32 0.25, %v468_v3 }
  0xee   :  { %v610_v7 = vpack.c.bf16 %v470_v5, %v469_v4 }
  0xf0   :  { %611 = vst [vmem:[%s1032_s3] sm:$0xff] %v610_v7  }

// kernel: lenet_forward.5
= control target key start
LH: loop header
LB: loop body
LE: loop exit
PB: predicated region body
PF: predicated region fallthrough
CT: control target
= control target key end

     0   :  { %s1049_s0 = inlined_call_operand.vmem [shape: bf16[2,512], index: 0, kind: input, shape index: {}]   ;;  %s1050_s1 = inlined_call_operand.vmem [shape: bf16[512,128], index: 1, kind: input, shape index: {}]   ;;  %s1051_s2 = inlined_call_operand.vmem [shape: f32[1,128], index: 2, kind: input, shape index: {}]   ;;  %s1052_s3 = inlined_call_operand.vmem [shape: bf16[128,128], index: 3, kind: input, shape index: {}]   ;;  %s1053_s4 = inlined_call_operand.vmem [shape: f32[1,128], index: 4, kind: input, shape index: {}]   ;;  %s1054_s5 = inlined_call_operand.vmem [shape: bf16[128,128], index: 5, kind: input, shape index: {}]   ;;  %s1055_s6 = inlined_call_operand.vmem [shape: f32[1,128], index: 6, kind: input, shape index: {}]   ;;  %s1056_s7 = inlined_call_operand.hbm [shape: f32[2,128], index: 7, kind: output, shape index: {}]  }
   0x1   :  { %v770_v0 = vld [vmem:[%s1050_s1 + $0x38] sm:$0xff]  ;;  %v769_v4 = vld [vmem:[%s1050_s1 + $0x30] sm:$0xff]  ;;  %v768_v8 = vld [vmem:[%s1050_s1 + $0x28] sm:$0xff] }
   0x2   :  { %v778_v1 = vld [vmem:[%s1050_s1 + $0x78] sm:$0xff]  ;;  %298 = vmatpush.bf16.msra.mxu0 %v770_v0  ;;  %v777_v5 = vld [vmem:[%s1050_s1 + $0x70] sm:$0xff]  ;;  %v776_v9 = vld [vmem:[%s1050_s1 + $0x68] sm:$0xff] }
   0x3   :  { %v786_v2 = vld [vmem:[%s1050_s1 + $0xb8] sm:$0xff]  ;;  %311 = vmatpush.bf16.msra.mxu1 %v778_v1  ;;  %v785_v6 = vld [vmem:[%s1050_s1 + $0xb0] sm:$0xff]  ;;  %v784_v10 = vld [vmem:[%s1050_s1 + $0xa8] sm:$0xff] }
   0x4   :  { %v794_v3 = vld [vmem:[%s1050_s1 + $0xf8] sm:$0xff]  ;;  %324 = vmatpush.bf16.msra.mxu2 %v786_v2  ;;  %v793_v7 = vld [vmem:[%s1050_s1 + $0xf0] sm:$0xff]  ;;  %v792_v11 = vld [vmem:[%s1050_s1 + $0xe8] sm:$0xff] }
   0x5   :  { %337 = vmatpush.bf16.msra.mxu3 %v794_v3  ;;  %v767_v12 = vld [vmem:[%s1050_s1 + $0x20] sm:$0xff] }
   0x6   :  { %299 = vmatpush.bf16.msra.mxu0 %v769_v4  ;;  %v775_v13 = vld [vmem:[%s1050_s1 + $0x60] sm:$0xff] }
   0x7   :  { %312 = vmatpush.bf16.msra.mxu1 %v777_v5  ;;  %v27_v14 = vld [vmem:[%s1049_s0] sm:$0xf] }
   0x8   :  { %325 = vmatpush.bf16.msra.mxu2 %v785_v6  ;;  %v783_v15 = vld [vmem:[%s1050_s1 + $0xa0] sm:$0xff]  ;;  %97 = vst [vmem:[#allocation1] ss:$9 sm:$0xff] %v27_v14 }
   0x9   :  { %338 = vmatpush.bf16.msra.mxu3 %v793_v7  ;;  %v791_v16 = vld [vmem:[%s1050_s1 + $0xe0] sm:$0xff] }
   0xa   :  { %300 = vmatpush.bf16.msra.mxu0 %v768_v8 }
   0xb   :  { %313 = vmatpush.bf16.msra.mxu1 %v776_v9 }
   0xc   :  { %326 = vmatpush.bf16.msra.mxu2 %v784_v10 }
   0xd   :  { %339 = vmatpush.bf16.msra.mxu3 %v792_v11 }
   0xe   :  { %12 = vsyncpa [#allocation3], 0  ;;  %301 = vmatpush.bf16.msra.mxu0 %v767_v12  ;;  %v766_v17 = vld [vmem:[%s1050_s1 + $0x18] sm:$0xff]  ;;  %v765_v21 = vld [vmem:[%s1050_s1 + $0x10] sm:$0xff]  ;;  %s849_s27 = smov [#allocation2]   ;;  %s560_s8 = sshll.u32 %s1056_s7, 4  ;;  %s561_s8 = int_to_ptr.hbm [resolvable:$true] %s560_s8 }
   0xf   :  { %314 = vmatpush.bf16.msra.mxu1 %v775_v13  ;;  %v774_v18 = vld [vmem:[%s1050_s1 + $0x58] sm:$0xff]  ;;  %v773_v22 = vld [vmem:[%s1050_s1 + $0x50] sm:$0xff]  ;;  %v764_v25 = vld [vmem:[%s1050_s1 + $0x8] sm:$0xff]  ;;  %s558_s28 = sshll.u32 %s849_s27, 4  ;;  %s559_s28 = int_to_ptr.vmem [resolvable:$true] %s558_s28 }
  0x10   :  { %327 = vmatpush.bf16.msra.mxu2 %v783_v15  ;;  %v782_v19 = vld [vmem:[%s1050_s1 + $0x98] sm:$0xff]  ;;  %v781_v23 = vld [vmem:[%s1050_s1 + $0x90] sm:$0xff]  ;;  %v772_v26 = vld [vmem:[%s1050_s1 + $0x48] sm:$0xff] }
  0x11   :  { %340 = vmatpush.bf16.msra.mxu3 %v791_v16  ;;  %v790_v20 = vld [vmem:[%s1050_s1 + $0xd8] sm:$0xff]  ;;  %v789_v24 = vld [vmem:[%s1050_s1 + $0xd0] sm:$0xff]  ;;  %v780_v27 = vld [vmem:[%s1050_s1 + $0x88] sm:$0xff] }
  0x12   :  { %302 = vmatpush.bf16.msra.mxu0 %v766_v17  ;;  %v788_v28 = vld [vmem:[%s1050_s1 + $0xc8] sm:$0xff]  ;;  %v763_v29 = vld [vmem:[%s1050_s1] sm:$0xff]  ;;  %v100_v35 = vld [vmem:[#allocation1 + $0x12] sm:$0xff] }
  0x13   :  { %315 = vmatpush.bf16.msra.mxu1 %v774_v18  ;;  %v771_v30 = vld [vmem:[%s1050_s1 + $0x40] sm:$0xff]  ;;  %v99_v34 = vld [vmem:[#allocation1 + $0x9] sm:$0xff]  ;;  %v802_v37 = vld [vmem:[%s1052_s3 + $0x38] sm:$0xff] }
  0x14   :  { %328 = vmatpush.bf16.msra.mxu2 %v782_v19  ;;  %v779_v31 = vld [vmem:[%s1050_s1 + $0x80] sm:$0xff]  ;;  %v801_v38 = vld [vmem:[%s1052_s3 + $0x30] sm:$0xff]  ;;  %v800_v39 = vld [vmem:[%s1052_s3 + $0x28] sm:$0xff] }
  0x15   :  { %341 = vmatpush.bf16.msra.mxu3 %v790_v20  ;;  %v787_v32 = vld [vmem:[%s1050_s1 + $0xc0] sm:$0xff]  ;;  %v798_v41 = vld [vmem:[%s1052_s3 + $0x18] sm:$0xff]  ;;  %v797_v42 = vld [vmem:[%s1052_s3 + $0x10] sm:$0xff] }
  0x16   :  { %303 = vmatpush.bf16.msra.mxu0 %v765_v21  ;;  %v98_v33 = vld [vmem:[#allocation1] sm:$0xff]  ;;  %v796_v44 = vld [vmem:[%s1052_s3 + $0x8] sm:$0xff]  ;;  %v810_v8 = vld [vmem:[%s1054_s5 + $0x38] sm:$0xff] }
  0x17   :  { %316 = vmatpush.bf16.msra.mxu1 %v773_v22  ;;  %v101_v36 = vld [vmem:[#allocation1 + $0x1b] sm:$0xff]  ;;  %v809_v9 = vld [vmem:[%s1054_s5 + $0x30] sm:$0xff]  ;;  %v808_v10 = vld [vmem:[%s1054_s5 + $0x28] sm:$0xff] }
  0x18   :  { %329 = vmatpush.bf16.msra.mxu2 %v781_v23  ;;  %v799_v40 = vld [vmem:[%s1052_s3 + $0x20] sm:$0xff]  ;;  %v806_v12 = vld [vmem:[%s1054_s5 + $0x18] sm:$0xff]  ;;  %v805_v13 = vld [vmem:[%s1054_s5 + $0x10] sm:$0xff] }
  0x19   :  { %342 = vmatpush.bf16.msra.mxu3 %v789_v24  ;;  %v812_v43 = vld [vmem:[%s1051_s2] ss:$0 sm:$0xff]  ;;  %v804_v14 = vld [vmem:[%s1054_s5 + $0x8] sm:$0xff] }
  0x1a   :  { %304 = vmatpush.bf16.msra.mxu0 %v764_v25  ;;  %v795_v48 = vld [vmem:[%s1052_s3] sm:$0xff] }
  0x1b   :  { %317 = vmatpush.bf16.msra.mxu1 %v772_v26  ;;  %v807_v11 = vld [vmem:[%s1054_s5 + $0x20] sm:$0xff] }
  0x1c   :  { %330 = vmatpush.bf16.msra.mxu2 %v780_v27  ;;  %v803_v15 = vld [vmem:[%s1054_s5] sm:$0xff] }
  0x1d   :  { %343 = vmatpush.bf16.msra.mxu3 %v788_v28  ;;  %v813_v16 = vld [vmem:[%s1053_s4] ss:$0 sm:$0xff] }
  0x1e   :  { %305 = vmatpush.bf16.msra.mxu0 %v763_v29 }
  0x1f   :  { %318 = vmatpush.bf16.msra.mxu1 %v771_v30 }
  0x20   :  { %331 = vmatpush.bf16.msra.mxu2 %v779_v31 }
  0x21   :  { %344 = vmatpush.bf16.msra.mxu3 %v787_v32  ;;  %306 = vmatmul.bf16.vlgmr.msra.gmra.mxu0 %v98_v33 }
  0x22   :  { %319 = vmatmul.bf16.vlgmr.msra.gmra.mxu1 %v99_v34  ;;  %438 = vmatpush.bf16.msrb.mxu0 %v802_v37  ;;  %v814_v34 = vld [vmem:[%s1055_s6] ss:$0 sm:$0xff] }
  0x23   :  { %332 = vmatmul.bf16.vlgmr.msra.gmra.mxu2 %v100_v35  ;;  %539 = vmatpush.bf16.msrb.mxu1 %v810_v8 }
  0x24   :  { %345 = vmatmul.bf16.vlgmr.msra.gmra.mxu3 %v101_v36 }
  0x26   :  { %439 = vmatpush.bf16.msrb.mxu0 %v801_v38 }
  0x27   :  { %540 = vmatpush.bf16.msrb.mxu1 %v809_v9 }
  0x2a   :  { %440 = vmatpush.bf16.msrb.mxu0 %v800_v39 }
  0x2b   :  { %541 = vmatpush.bf16.msrb.mxu1 %v808_v10 }
  0x2e   :  { %441 = vmatpush.bf16.msrb.mxu0 %v799_v40 }
  0x2f   :  { %542 = vmatpush.bf16.msrb.mxu1 %v807_v11 }
  0x32   :  { %442 = vmatpush.bf16.msrb.mxu0 %v798_v41 }
  0x33   :  { %543 = vmatpush.bf16.msrb.mxu1 %v806_v12 }
  0x36   :  { %443 = vmatpush.bf16.msrb.mxu0 %v797_v42 }
  0x37   :  { %544 = vmatpush.bf16.msrb.mxu1 %v805_v13 }
  0x3a   :  { %444 = vmatpush.bf16.msrb.mxu0 %v796_v44 }
  0x3b   :  { %545 = vmatpush.bf16.msrb.mxu1 %v804_v14 }
  0x3e   :  { %445 = vmatpush.bf16.msrb.mxu0 %v795_v48 }
  0x3f   :  { %546 = vmatpush.bf16.msrb.mxu1 %v803_v15 }
  0x9e   :  { %v307_v45 = vpop.f32.mrf.mxu0 }
  0x9f   :  { %v320_v46 = vpop.f32.mrf.mxu1  ;;  %v308_v47 = vadd.f32 %v812_v43, %v307_v45 }
  0xa1   :  { %v321_v49 = vadd.f32 %v320_v46, %v308_v47 }
  0xa6   :  { %v333_v50 = vpop.f32.mrf.mxu2  ;;  %v309_v53 = vpop.f32.mrf.mxu0 }
  0xa7   :  { %v346_v51 = vpop.f32.mrf.mxu3  ;;  %v334_v52 = vadd.f32 %v333_v50, %v321_v49  ;;  %v322_v54 = vpop.f32.mrf.mxu1 }
  0xa9   :  { %v347_v55 = vadd.f32 %v346_v51, %v334_v52 }
  0xab   :  { %v697_v56 = vmul.f32 -1.442695, %v347_v55 }
  0xad   :  { %815 = vpow2.f32 %v697_v56 }
  0xae   :  { %v335_v57 = vpop.f32.mrf.mxu2 }
  0xaf   :  { %v348_v58 = vpop.f32.mrf.mxu3 }
  0xb3   :  { %v816_v59 = vpop.eup %815 }
  0xb4   :  { %v353_v60 = vadd.f32 1.0, %v816_v59 }
  0xb6   :  { %817 = vrcp.f32 %v353_v60  ;;  %v365_v0 = vand.u32 2147483648, %v353_v60  ;;  %v363_v2 = vand.u32 2147483647, %v353_v60  ;;  %vm359_vm1 = vweird.f32 %v353_v60 }
  0xb8   :  { %v366_v4 = vor.u32 1.1754944e-38, %v365_v0  ;;  %vm364_vm3 = vcmp.eq.f32.partialorder %v363_v2, 8.507059e+37 }
  0xbc   :  { %v818_v61 = vpop.eup %817 }
  0xbd   :  { %v355_v62 = vmul.f32 %v818_v61, %v353_v60  ;;  %vm360_vm0 = vweird.f32 %v818_v61 }
  0xbe   :  { %vm361_vm2 = vmor %vm359_vm1, %vm360_vm0 }
  0xbf   :  { %v356_v63 = vsub.f32 1.0, %v355_v62 }
  0xc1   :  { %v357_v1 = vmul.f32 %v818_v61, %v356_v63 }
  0xc3   :  { %v358_v3 = vadd.f32 %v818_v61, %v357_v1 }
  0xc5   :  { %v362_v5 = vsel %vm361_vm2, %v818_v61, %v358_v3 }
  0xc6   :  { %v367_v6 = vsel %vm364_vm3, %v366_v4, %v362_v5 }
  0xc7   :  { %v369_v7 = vpack.c.bf16 %v367_v6, %v367_v6 }
  0xc9   :  { %446 = vmatmul.bf16.vlgmr.msrb.gmra.mxu0 %v369_v7 }
 0x146   :  { %v447_v17 = vpop.f32.mrf.mxu0 }
 0x147   :  { %v448_v18 = vadd.f32 %v813_v16, %v447_v17 }
 0x149   :  { %v730_v19 = vmul.f32 -1.442695, %v448_v18 }
 0x14b   :  { %819 = vpow2.f32 %v730_v19 }
 0x14e   :  { %v449_v20 = vpop.f32.mrf.mxu0 }
 0x151   :  { %v820_v21 = vpop.eup %819 }
 0x152   :  { %v454_v22 = vadd.f32 1.0, %v820_v21 }
 0x154   :  { %821 = vrcp.f32 %v454_v22  ;;  %v466_v26 = vand.u32 2147483648, %v454_v22  ;;  %v464_v28 = vand.u32 2147483647, %v454_v22  ;;  %vm460_vm5 = vweird.f32 %v454_v22 }
 0x156   :  { %v467_v30 = vor.u32 1.1754944e-38, %v466_v26  ;;  %vm465_vm7 = vcmp.eq.f32.partialorder %v464_v28, 8.507059e+37 }
 0x15a   :  { %v822_v23 = vpop.eup %821 }
 0x15b   :  { %v456_v24 = vmul.f32 %v822_v23, %v454_v22  ;;  %vm461_vm4 = vweird.f32 %v822_v23 }
 0x15c   :  { %vm462_vm6 = vmor %vm460_vm5, %vm461_vm4 }
 0x15d   :  { %v457_v25 = vsub.f32 1.0, %v456_v24 }
 0x15f   :  { %v458_v27 = vmul.f32 %v822_v23, %v457_v25 }
 0x161   :  { %v459_v29 = vadd.f32 %v822_v23, %v458_v27 }
 0x163   :  { %v463_v31 = vsel %vm462_vm6, %v822_v23, %v459_v29 }
 0x164   :  { %v468_v32 = vsel %vm465_vm7, %v467_v30, %v463_v31 }
 0x165   :  { %v470_v33 = vpack.c.bf16 %v468_v32, %v468_v32 }
 0x167   :  { %547 = vmatmul.bf16.vlgmr.msrb.gmra.mxu1 %v470_v33 }
 0x1e4   :  { %v548_v35 = vpop.f32.mrf.mxu1 }
 0x1e5   :  { %v549_v36 = vadd.f32 %v814_v34, %v548_v35 }
 0x1e7   :  { %552 = vst [vmem:[#allocation2] sm:$0x3] %v549_v36 }
 0x1e8   :  { %563 = dma.vmem_to_hbm [thread:$0]  %s559_s28, 32, %s561_s8, [#allocation3]  }
 0x1ec   :  { %v550_v37 = vpop.f32.mrf.mxu1 }
 0x1ed   :  { %847 = dma.done.wait [#allocation3], 32  }
 0x1ee   :  { %848 = vsyncadd [#allocation3], 4294967264 }
 0x1ef   :  { %568 = vsyncpa [#allocation3], 1 }

</bundles_post_ra>
